<compile_context>
chip_gen: v6e
topology: v6e:2x2x1
jax: 0.10.0
libtpu: 0.0.40
codegen_flags: <defaults>
</compile_context>

<pallas_src>
import functools

import jax
import jax.numpy as jnp
from jax import lax
from jax.experimental import pallas as pl
from jax.experimental.pallas import tpu as pltpu

# ---------------- configuration (mirrors the PyTorch module instance) --------
INPUT_SIZE = 8
CAT_INPUT_SIZES = ((4, 3), (5, 4))     # (levels, embedding_size)
AUX_INPUT_SIZE = 2
LIN_LAYER_SIZES = (32, 16)
NO_CROSS_LAYERS = 2

EMB_SIZES = tuple(e for _, e in CAT_INPUT_SIZES)
LEVELS = tuple(l for l, _ in CAT_INPUT_SIZES)
D0 = INPUT_SIZE + sum(EMB_SIZES)            # 15  (cross-layer feature width)
RAW_IN = INPUT_SIZE + sum(LEVELS)           # 17  (raw x width)
D0A = D0 + AUX_INPUT_SIZE                   # 17  (cross slab incl. aux rows)
L0, L1 = LIN_LAYER_SIZES                    # 32, 16
OUT_IN = L1 + D0 + AUX_INPUT_SIZE           # 33  (output layer input)

H0_OFF = (D0A + 7) // 8 * 8                 # 24  (layer-0 preact rows, 8-aligned)
SLAB_H = H0_OFF + L0                        # 56  (stacked-dot result height)

TILE_B = 4096                               # batch rows per grid step (lanes)


def _rup(x, m):
    return (x + m - 1) // m * m


# ---------------- packed-weight layouts (VMEM-resident buffers) --------------
def _build_mat_layout():
    offs, r = {}, 0

    def alloc(name, h):
        nonlocal r
        offs[name] = r
        r = _rup(r + h, 16)         # 16-row aligned starts (bf16 sublane packing)

    alloc("sx", SLAB_H)             # (SLAB_H, RAW_IN)  stacked [E | w0_x^T]
    alloc("saux", SLAB_H)           # (SLAB_H, AUX)     stacked [I_aux | w0_aux^T]
    alloc("w1", L1)                 # (L1, L0)          MLP layer-1 weight^T
    return offs, r


def _build_vec_layout():
    offs, r = {}, 0

    def alloc(name, h):
        nonlocal r
        offs[name] = r
        r = _rup(r + h, 8)

    alloc("b0", L0)
    alloc("b1", L1)
    alloc("mask", D0A)              # zeros the aux rows of x0 in the recurrence
    for l in range(NO_CROSS_LAYERS):
        alloc(f"cw{l}", D0A)
    for l in range(NO_CROSS_LAYERS):
        alloc(f"cb{l}", D0A)
    alloc("woh", L1)                # output weights, MLP part
    alloc("woc", D0A)               # output weights, cross ++ aux part
    return offs, r


_MOFFS, WM_ROWS = _build_mat_layout()
WM_COLS = max(RAW_IN, AUX_INPUT_SIZE, L0)          # 32
_VOFFS, WV_ROWS = _build_vec_layout()


# ---------------- Pallas kernel ----------------------------------------------
def _critic_kernel(x_ref, aux_ref, wm_ref, wv_ref, bo_ref, o_ref):
    # x_ref  : (TB, RAW_IN)   batch-major batch tile (contiguous HBM DMA)
    # aux_ref: (TB, AUX)      batch-major aux tile
    # wm_ref : (WM_ROWS, WM_COLS) packed MXU matrices (bf16 or f32), VMEM-resident
    # wv_ref : (WV_ROWS, 1)   packed f32 per-feature vectors, VMEM-resident
    # bo_ref : (1, 1)         output-layer bias scalar in SMEM
    # o_ref  : (1, TB)        lane-dense output tile
    def mat(name, nrows, ncols):
        r = _MOFFS[name]
        return wm_ref[r:r + nrows, 0:ncols]

    def vec(name, nrows):
        r = _VOFFS[name]
        return wv_ref[r:r + nrows, 0:1]

    cdt = wm_ref.dtype                              # MXU operand dtype (bf16/f32)
    dn = (((1,), (1,)), ((), ()))                   # contract feature axes:
                                                    # (M,F)·(T,F) -> (M,T) feature-major

    # One fused, stacked contraction per input operand.  Rows of the slab:
    #   [0, D0)           : x0 = [x_cont | emb0 | emb1]
    #   [D0, D0A)         : aux (identity rows in S_aux)
    #   [H0_OFF, +L0)     : MLP layer-0 pre-activation (soft embeddings folded in)
    # The transposed-RHS dot lets the MXU produce feature-major tiles directly
    # from the batch-major input (no host transpose, no separate E_aug/w0 dots).
    slab = lax.dot_general(mat("sx", SLAB_H, RAW_IN), x_ref[...].astype(cdt),
                           dn, preferred_element_type=jnp.float32)
    slab += lax.dot_general(mat("saux", SLAB_H, AUX_INPUT_SIZE),
                            aux_ref[...].astype(cdt),
                            dn, preferred_element_type=jnp.float32)   # (SLAB_H, T)

    x0aux = slab[0:D0A, :]                          # (17, T): [x0 | aux]
    x0 = x0aux * vec("mask", D0A)                   # aux rows zeroed for recurrence

    # ReLU MLP (layer-0 pre-activation already in the slab).
    h = jnp.maximum(slab[H0_OFF:H0_OFF + L0, :] + vec("b0", L0), 0.0)      # (32, T)
    h = jnp.dot(mat("w1", L1, L0), h.astype(cdt),
                preferred_element_type=jnp.float32) + vec("b1", L1)
    h = jnp.maximum(h, 0.0)                                                # (16, T)

    # Cross layers: one VPU multiply + one sublane reduction per layer.
    # Aux rows ride along unchanged (their cross weights / biases are zero).
    cross = x0aux
    for l in range(NO_CROSS_LAYERS):
        s = jnp.sum(cross * vec(f"cw{l}", D0A), axis=0, keepdims=True)     # (1, T)
        cross = x0 * s + vec(f"cb{l}", D0A) + cross

    # Output layer: lane-dense (1, T); aux contribution lives inside `cross`.
    out = (jnp.sum(h * vec("woh", L1), axis=0, keepdims=True)
           + jnp.sum(cross * vec("woc", D0A), axis=0, keepdims=True)
           + bo_ref[0, 0])
    o_ref[...] = out


# ---------------- host-side weight packing / folding (call ONCE) -------------
def pack_params(params, dot_dtype=jnp.bfloat16):
    """Pack + constant-fold all weights into (wm, wv, bo).

    Hoisted out of the per-forward jit (perf review item 6): call once per
    parameter set and pass the results to critic_forward.
    """
    f32 = jnp.float32
    hi = jax.lax.Precision.HIGHEST

    # ---- S_x: consumes x (17 raw features) ----------------------------------
    sx = jnp.zeros((SLAB_H, RAW_IN), f32)
    sx = sx.at[0:INPUT_SIZE, 0:INPUT_SIZE].set(jnp.eye(INPUT_SIZE, dtype=f32))
    r, c = INPUT_SIZE, INPUT_SIZE
    for k, (lv, em) in enumerate(CAT_INPUT_SIZES):
        sx = sx.at[r:r + em, c:c + lv].set(params["emb_w"][k].T.astype(f32))
        r += em
        c += lv
    w0 = params["lin_w"][0].astype(f32)                       # (17, 32): [cont|emb|aux]
    w0x = jnp.zeros((RAW_IN, L0), f32)
    w0x = w0x.at[0:INPUT_SIZE, :].set(w0[0:INPUT_SIZE, :])
    r, c = INPUT_SIZE, INPUT_SIZE
    for k, (lv, em) in enumerate(CAT_INPUT_SIZES):
        # soft-embedding fold: emb(x_cat) @ W0_slice == x_cat @ (emb_w @ W0_slice)
        fold = jnp.matmul(params["emb_w"][k].astype(f32), w0[c:c + em, :], precision=hi)
        w0x = w0x.at[r:r + lv, :].set(fold)
        r += lv
        c += em
    sx = sx.at[H0_OFF:H0_OFF + L0, :].set(w0x.T)

    # ---- S_aux: consumes aux (2 features) -----------------------------------
    saux = jnp.zeros((SLAB_H, AUX_INPUT_SIZE), f32)
    saux = saux.at[D0:D0A, :].set(jnp.eye(AUX_INPUT_SIZE, dtype=f32))
    saux = saux.at[H0_OFF:H0_OFF + L0, :].set(w0[D0:D0A, :].T)

    wm = jnp.zeros((WM_ROWS, WM_COLS), f32)
    wm = wm.at[_MOFFS["sx"]:_MOFFS["sx"] + SLAB_H, 0:RAW_IN].set(sx)
    wm = wm.at[_MOFFS["saux"]:_MOFFS["saux"] + SLAB_H, 0:AUX_INPUT_SIZE].set(saux)
    wm = wm.at[_MOFFS["w1"]:_MOFFS["w1"] + L1, 0:L0].set(params["lin_w"][1].T.astype(f32))
    wm = wm.astype(dot_dtype)

    # ---- f32 per-feature vectors (VPU operands) ------------------------------
    wv = jnp.zeros((WV_ROWS, 1), f32)

    def put(buf, name, v1d):
        r0 = _VOFFS[name]
        return buf.at[r0:r0 + v1d.shape[0], 0].set(v1d.astype(f32))

    wv = put(wv, "b0", params["lin_b"][0].reshape(-1))
    wv = put(wv, "b1", params["lin_b"][1].reshape(-1))
    zpad = jnp.zeros((AUX_INPUT_SIZE,), f32)
    wv = put(wv, "mask", jnp.concatenate([jnp.ones((D0,), f32), zpad]))
    for l in range(NO_CROSS_LAYERS):
        wv = put(wv, f"cw{l}", jnp.concatenate([params["cross_w"][l], zpad]))
        wv = put(wv, f"cb{l}", jnp.concatenate([params["cross_b"][l], zpad]))
    ow = params["out_w"].reshape(-1)                          # (33,) = [h | cross | aux]
    wv = put(wv, "woh", ow[0:L1])
    wv = put(wv, "woc", ow[L1:L1 + D0A])

    bo = params["out_b"].reshape(1, 1).astype(f32)
    return wm, wv, bo


# ---------------- wrapper: grid over batch, weights resident ------------------
@functools.partial(jax.jit, static_argnames=("tile_b",))
def critic_forward(x, aux, wm, wv, bo, tile_b=TILE_B):
    b = x.shape[0]
    b128 = _rup(b, 128)
    tb = min(tile_b, b128)
    # Keep >= 2 grid steps when the batch allows it (v7x has 2 TensorCores).
    if tb == b128 and b128 >= 256:
        tb = _rup(b128 // 2, 128)
    b_pad = _rup(b, tb)

    x = x.astype(jnp.float32)
    aux = aux.astype(jnp.float32)
    if b_pad != b:                                   # only when batch % tb != 0
        x = jnp.pad(x, ((0, b_pad - b), (0, 0)))
        aux = jnp.pad(aux, ((0, b_pad - b), (0, 0)))

    out = pl.pallas_call(
        _critic_kernel,
        out_shape=jax.ShapeDtypeStruct((1, b_pad), jnp.float32),
        grid=(b_pad // tb,),
        in_specs=[
            # batch-major activation tiles: contiguous HBM DMAs, no host staging
            pl.BlockSpec((tb, RAW_IN), lambda i: (i, 0)),
            pl.BlockSpec((tb, AUX_INPUT_SIZE), lambda i: (i, 0)),
            # packed weights: constant block index -> DMA'd once, VMEM-resident
            pl.BlockSpec((WM_ROWS, WM_COLS), lambda i: (0, 0)),
            pl.BlockSpec((WV_ROWS, 1), lambda i: (0, 0)),
            # output-layer bias as a true scalar in SMEM
            pl.BlockSpec(memory_space=pltpu.MemorySpace.SMEM),
        ],
        out_specs=pl.BlockSpec((1, tb), lambda i: (0, i)),     # lane-dense output
        compiler_params=pltpu.CompilerParams(
            dimension_semantics=("parallel",),
        ),
    )(x, aux, wm, wv, bo)
    return out[0, :b].reshape(b, 1)


# ---------------- pure-JAX reference (mirrors PyTorch forward exactly) -------
def critic_ref(x, aux, params):
    i = INPUT_SIZE
    x_emb = []
    for k, (lv, _) in enumerate(CAT_INPUT_SIZES):
        x_emb.append(x[:, i:i + lv] @ params["emb_w"][k])
        i += lv
    x0 = jnp.concatenate([x[:, :INPUT_SIZE]] + x_emb, axis=1)        # (B, D0)
    x_full = jnp.concatenate([x0, aux], axis=1)                      # (B, 17)

    h = x_full
    for w, b in zip(params["lin_w"], params["lin_b"]):
        h = jnp.maximum(h @ w + b, 0.0)

    xc = x0
    for l in range(NO_CROSS_LAYERS):
        s = jnp.sum(xc * params["cross_w"][l][None, :], axis=1, keepdims=True)
        xc = x0 * s + params["cross_b"][l][None, :] + xc

    cat = jnp.concatenate([h, xc, aux], axis=1)
    return cat @ params["out_w"] + params["out_b"]


# ---------------- deterministic parameter init --------------------------------
def init_params(key):
    ks = jax.random.split(key, 16)
    params = {}
    params["emb_w"] = [
        0.2 * jax.random.normal(ks[k], (lv, em), jnp.float32)
        for k, (lv, em) in enumerate(CAT_INPUT_SIZES)
    ]
    lin_in = [D0 + AUX_INPUT_SIZE] + list(LIN_LAYER_SIZES[:-1])
    params["lin_w"] = [
        0.2 * jax.random.normal(ks[4 + li], (din, dout), jnp.float32)
        for li, (din, dout) in enumerate(zip(lin_in, LIN_LAYER_SIZES))
    ]
    params["lin_b"] = [
        0.01 * jnp.ones((1, dout), jnp.float32) for dout in LIN_LAYER_SIZES
    ]
    # Cross: weights ~ N(0, sqrt(2/D0)), bias = 0 (as in the PyTorch init)
    params["cross_w"] = (jnp.sqrt(2.0 / D0) *
                         jax.random.normal(ks[8], (NO_CROSS_LAYERS, D0), jnp.float32))
    params["cross_b"] = jnp.zeros((NO_CROSS_LAYERS, D0), jnp.float32)
    params["out_w"] = 0.2 * jax.random.normal(ks[9], (OUT_IN, 1), jnp.float32)
    params["out_b"] = 0.01 * jnp.ones((1, 1), jnp.float32)
    return params


if __name__ == "__main__":
    key = jax.random.PRNGKey(0)
    k_x, k_aux, k_p = jax.random.split(key, 3)

    BATCH = 1024   # -> 2 grid steps of 512 (exercises the pipeline / 2-TC split)
    x = jax.random.normal(k_x, (BATCH, RAW_IN), jnp.float32)              # (1024, 17)
    aux = jax.random.normal(k_aux, (BATCH, AUX_INPUT_SIZE), jnp.float32)  # (1024, 2)
    params = init_params(k_p)

    ref = jax.block_until_ready(critic_ref(x, aux, params))

    # 1) f32 MXU operands: validates the fused/stacked structure exactly.
    wm32, wv32, bo32 = pack_params(params, dot_dtype=jnp.float32)
    out32 = jax.block_until_ready(critic_forward(x, aux, wm32, wv32, bo32))
    assert out32.shape == (BATCH, 1)
    assert jnp.allclose(out32, ref, rtol=1e-3, atol=1e-3), (
        float(jnp.max(jnp.abs(out32 - ref))))

    # 2) bf16 MXU operands with f32 accumulation: the fast default.
    wmbf, wvbf, bobf = pack_params(params, dot_dtype=jnp.bfloat16)
    outbf = jax.block_until_ready(critic_forward(x, aux, wmbf, wvbf, bobf))
    err = float(jnp.max(jnp.abs(outbf - ref)))
    scale = float(jnp.max(jnp.abs(ref)))
    assert err <= 0.05 * scale, (err, scale)      # bf16-operand tolerance (review caveat)

    print("KERNEL_OK")
</pallas_src>

<mosaic_0001>
module attributes {stable_mosaic.version = 11 : i64} {
  func.func @_critic_kernel(%arg0: i32, %arg1: memref<512x17xf32, #tpu.memory_space<vmem>>, %arg2: memref<512x2xf32, #tpu.memory_space<vmem>>, %arg3: memref<144x32xf32, #tpu.memory_space<vmem>>, %arg4: memref<208x1xf32, #tpu.memory_space<vmem>>, %arg5: memref<1x1xf32, #tpu.memory_space<smem>>, %arg6: memref<1x512xf32, #tpu.memory_space<vmem>>) attributes {dimension_semantics = [#tpu.dimension_semantics<parallel>], iteration_bounds = array<i64: 2>, scalar_prefetch = 0 : i64, scratch_operands = 0 : i64, tpu.core_type = #tpu.core_type<tc>, window_params = [{transform_indices = @transform_0, window_bounds = array<i64: 512, 17>}, {transform_indices = @transform_1, window_bounds = array<i64: 512, 2>}, {pipeline_mode = #tpu.pipeline_mode<synchronous>, transform_indices = @transform_2, window_bounds = array<i64: 144, 32>}, {pipeline_mode = #tpu.pipeline_mode<synchronous>, transform_indices = @transform_3, window_bounds = array<i64: 208, 1>}, {transform_indices = @transform_4, window_bounds = array<i64: 1, 1>}, {transform_indices = @transform_5, window_bounds = array<i64: 1, 512>}]} {
    %c0 = arith.constant 0 : index
    %c0_0 = arith.constant 0 : index
    %0 = vector.load %arg3[%c0, %c0_0] : memref<144x32xf32, #tpu.memory_space<vmem>>, vector<56x17xf32>
    %c0_1 = arith.constant 0 : index
    %c0_2 = arith.constant 0 : index
    %1 = vector.load %arg1[%c0_1, %c0_2] : memref<512x17xf32, #tpu.memory_space<vmem>>, vector<512x17xf32>
    %cst = arith.constant dense<0.000000e+00> : vector<56x512xf32>
    %2 = tpu.matmul %0, %1, %cst {dimension_numbers = #tpu.dot_dimension_numbers<[1], [1], [0], [0], [0, 0, 1, 0], [], []>} : vector<56x17xf32>, vector<512x17xf32>, vector<56x512xf32> -> vector<56x512xf32>
    %c64 = arith.constant 64 : index
    %c0_3 = arith.constant 0 : index
    %3 = vector.load %arg3[%c64, %c0_3] : memref<144x32xf32, #tpu.memory_space<vmem>>, vector<56x2xf32>
    %c0_4 = arith.constant 0 : index
    %c0_5 = arith.constant 0 : index
    %4 = vector.load %arg2[%c0_4, %c0_5] : memref<512x2xf32, #tpu.memory_space<vmem>>, vector<512x2xf32>
    %cst_6 = arith.constant dense<0.000000e+00> : vector<56x512xf32>
    %5 = tpu.matmul %3, %4, %cst_6 {dimension_numbers = #tpu.dot_dimension_numbers<[1], [1], [0], [0], [0, 0, 1, 0], [], []>} : vector<56x2xf32>, vector<512x2xf32>, vector<56x512xf32> -> vector<56x512xf32>
    %6 = arith.addf %2, %5 : vector<56x512xf32>
    %7 = vector.extract_strided_slice %6 {offsets = [0, 0], sizes = [17, 512], strides = [1, 1]} : vector<56x512xf32> to vector<17x512xf32>
    %c48 = arith.constant 48 : index
    %c0_7 = arith.constant 0 : index
    %8 = vector.load %arg4[%c48, %c0_7] : memref<208x1xf32, #tpu.memory_space<vmem>>, vector<17x1xf32>
    %9 = vector.broadcast %8 : vector<17x1xf32> to vector<17x512xf32>
    %10 = arith.mulf %7, %9 : vector<17x512xf32>
    %11 = vector.extract_strided_slice %6 {offsets = [24, 0], sizes = [32, 512], strides = [1, 1]} : vector<56x512xf32> to vector<32x512xf32>
    %c0_8 = arith.constant 0 : index
    %c0_9 = arith.constant 0 : index
    %12 = vector.load %arg4[%c0_8, %c0_9] : memref<208x1xf32, #tpu.memory_space<vmem>>, vector<32x1xf32>
    %13 = vector.broadcast %12 : vector<32x1xf32> to vector<32x512xf32>
    %14 = arith.addf %11, %13 : vector<32x512xf32>
    %cst_10 = arith.constant 0.000000e+00 : f32
    %15 = vector.broadcast %cst_10 : f32 to vector<32x512xf32>
    %16 = arith.maximumf %14, %15 : vector<32x512xf32>
    %c128 = arith.constant 128 : index
    %c0_11 = arith.constant 0 : index
    %17 = vector.load %arg3[%c128, %c0_11] : memref<144x32xf32, #tpu.memory_space<vmem>>, vector<16x32xf32>
    %cst_12 = arith.constant dense<0.000000e+00> : vector<16x512xf32>
    %18 = tpu.matmul %17, %16, %cst_12 {dimension_numbers = #tpu.dot_dimension_numbers<[1], [0], [0], [1], [0, 0, 1, 1], [], []>} : vector<16x32xf32>, vector<32x512xf32>, vector<16x512xf32> -> vector<16x512xf32>
    %c32 = arith.constant 32 : index
    %c0_13 = arith.constant 0 : index
    %19 = vector.load %arg4[%c32, %c0_13] : memref<208x1xf32, #tpu.memory_space<vmem>>, vector<16x1xf32>
    %20 = vector.broadcast %19 : vector<16x1xf32> to vector<16x512xf32>
    %21 = arith.addf %18, %20 : vector<16x512xf32>
    %cst_14 = arith.constant 0.000000e+00 : f32
    %22 = vector.broadcast %cst_14 : f32 to vector<16x512xf32>
    %23 = arith.maximumf %21, %22 : vector<16x512xf32>
    %c72 = arith.constant 72 : index
    %c0_15 = arith.constant 0 : index
    %24 = vector.load %arg4[%c72, %c0_15] : memref<208x1xf32, #tpu.memory_space<vmem>>, vector<17x1xf32>
    %25 = vector.broadcast %24 : vector<17x1xf32> to vector<17x512xf32>
    %26 = arith.mulf %7, %25 : vector<17x512xf32>
    %cst_16 = arith.constant dense<0.000000e+00> : vector<512xf32>
    %27 = vector.multi_reduction <add>, %26, %cst_16 [0] : vector<17x512xf32> to vector<512xf32>
    %28 = vector.shape_cast %27 : vector<512xf32> to vector<1x512xf32>
    %29 = vector.broadcast %28 : vector<1x512xf32> to vector<17x512xf32>
    %30 = arith.mulf %10, %29 : vector<17x512xf32>
    %c120 = arith.constant 120 : index
    %c0_17 = arith.constant 0 : index
    %31 = vector.load %arg4[%c120, %c0_17] : memref<208x1xf32, #tpu.memory_space<vmem>>, vector<17x1xf32>
    %32 = vector.broadcast %31 : vector<17x1xf32> to vector<17x512xf32>
    %33 = arith.addf %30, %32 : vector<17x512xf32>
    %34 = arith.addf %33, %7 : vector<17x512xf32>
    %c96 = arith.constant 96 : index
    %c0_18 = arith.constant 0 : index
    %35 = vector.load %arg4[%c96, %c0_18] : memref<208x1xf32, #tpu.memory_space<vmem>>, vector<17x1xf32>
    %36 = vector.broadcast %35 : vector<17x1xf32> to vector<17x512xf32>
    %37 = arith.mulf %34, %36 : vector<17x512xf32>
    %cst_19 = arith.constant dense<0.000000e+00> : vector<512xf32>
    %38 = vector.multi_reduction <add>, %37, %cst_19 [0] : vector<17x512xf32> to vector<512xf32>
    %39 = vector.shape_cast %38 : vector<512xf32> to vector<1x512xf32>
    %40 = vector.broadcast %39 : vector<1x512xf32> to vector<17x512xf32>
    %41 = arith.mulf %10, %40 : vector<17x512xf32>
    %c144 = arith.constant 144 : index
    %c0_20 = arith.constant 0 : index
    %42 = vector.load %arg4[%c144, %c0_20] : memref<208x1xf32, #tpu.memory_space<vmem>>, vector<17x1xf32>
    %43 = vector.broadcast %42 : vector<17x1xf32> to vector<17x512xf32>
    %44 = arith.addf %41, %43 : vector<17x512xf32>
    %45 = arith.addf %44, %34 : vector<17x512xf32>
    %c168 = arith.constant 168 : index
    %c0_21 = arith.constant 0 : index
    %46 = vector.load %arg4[%c168, %c0_21] : memref<208x1xf32, #tpu.memory_space<vmem>>, vector<16x1xf32>
    %47 = vector.broadcast %46 : vector<16x1xf32> to vector<16x512xf32>
    %48 = arith.mulf %23, %47 : vector<16x512xf32>
    %cst_22 = arith.constant dense<0.000000e+00> : vector<512xf32>
    %49 = vector.multi_reduction <add>, %48, %cst_22 [0] : vector<16x512xf32> to vector<512xf32>
    %50 = vector.shape_cast %49 : vector<512xf32> to vector<1x512xf32>
    %c184 = arith.constant 184 : index
    %c0_23 = arith.constant 0 : index
    %51 = vector.load %arg4[%c184, %c0_23] : memref<208x1xf32, #tpu.memory_space<vmem>>, vector<17x1xf32>
    %52 = vector.broadcast %51 : vector<17x1xf32> to vector<17x512xf32>
    %53 = arith.mulf %45, %52 : vector<17x512xf32>
    %cst_24 = arith.constant dense<0.000000e+00> : vector<512xf32>
    %54 = vector.multi_reduction <add>, %53, %cst_24 [0] : vector<17x512xf32> to vector<512xf32>
    %55 = vector.shape_cast %54 : vector<512xf32> to vector<1x512xf32>
    %56 = arith.addf %50, %55 : vector<1x512xf32>
    %c0_25 = arith.constant 0 : index
    %c0_26 = arith.constant 0 : index
    %57 = memref.load %arg5[%c0_25, %c0_26] : memref<1x1xf32, #tpu.memory_space<smem>>
    %58 = vector.broadcast %57 : f32 to vector<1x512xf32>
    %59 = arith.addf %56, %58 : vector<1x512xf32>
    %c0_27 = arith.constant 0 : index
    %c0_28 = arith.constant 0 : index
    %60 = vector.load %arg6[%c0_27, %c0_28] : memref<1x512xf32, #tpu.memory_space<vmem>>, vector<1x512xf32>
    tpu.vector_store %arg6[%c0_27, %c0_28], %59 {strides = array<i32>} : memref<1x512xf32, #tpu.memory_space<vmem>>, vector<1x512xf32>,
    return
  }
  func.func @transform_0(%arg0: i32) -> (i32, i32) {
    %c0_i32 = arith.constant 0 : i32
    %c0_i32_0 = arith.constant 0 : i32
    return %arg0, %c0_i32 : i32, i32
  }
  func.func @transform_1(%arg0: i32) -> (i32, i32) {
    %c0_i32 = arith.constant 0 : i32
    %c0_i32_0 = arith.constant 0 : i32
    return %arg0, %c0_i32 : i32, i32
  }
  func.func @transform_2(%arg0: i32) -> (i32, i32) {
    %c0_i32 = arith.constant 0 : i32
    %c0_i32_0 = arith.constant 0 : i32
    %c0_i32_1 = arith.constant 0 : i32
    return %c0_i32, %c0_i32_0 : i32, i32
  }
  func.func @transform_3(%arg0: i32) -> (i32, i32) {
    %c0_i32 = arith.constant 0 : i32
    %c0_i32_0 = arith.constant 0 : i32
    %c0_i32_1 = arith.constant 0 : i32
    return %c0_i32, %c0_i32_0 : i32, i32
  }
  func.func @transform_4(%arg0: i32) -> (i32, i32) {
    %c0_i32 = arith.constant 0 : i32
    %c0_i32_0 = arith.constant 0 : i32
    %c0_i32_1 = arith.constant 0 : i32
    return %c0_i32, %c0_i32_0 : i32, i32
  }
  func.func @transform_5(%arg0: i32) -> (i32, i32) {
    %c0_i32 = arith.constant 0 : i32
    %c0_i32_0 = arith.constant 0 : i32
    return %c0_i32, %arg0 : i32, i32
  }
}

</mosaic_0001>

<bundles_post_ra>
// kernel: critic_forward.1
= control target key start
LH: loop header
LB: loop body
LE: loop exit
PB: predicated region body
PF: predicated region fallthrough
CT: control target
= control target key end

     0   :  { %s3365_s0 = inlined_call_operand.vmem [shape: f32[1024,17], index: 0, kind: input, shape index: {}]   ;;  %s3366_s1 = inlined_call_operand.vmem [shape: f32[1024,2], index: 1, kind: input, shape index: {}]   ;;  %s3367_s2 = inlined_call_operand.vmem [shape: f32[144,32], index: 2, kind: input, shape index: {}]   ;;  %s3368_s3 = inlined_call_operand.vmem [shape: f32[208,1], index: 3, kind: input, shape index: {}]   ;;  %s3369_s4 = inlined_call_operand.<no memory space> [shape: f32[1,1], index: 4, kind: input, shape index: {}]   ;;  %s3370_s5 = inlined_call_operand.hbm [shape: f32[1,1024], index: 5, kind: output, shape index: {}]  }
   0x1   :  { %10 = sst [smem:[#allocation2]] %s3369_s4 }
   0x2   :  { %11 = vsyncpa [#allocation4], 0 }
   0x3   :  { %13 = vsyncpa [#allocation4 + $0x1], 0  ;;  %s2503_s20 = smov 0   ;;  %s2505_s21 = smov 0  }
   0x4   :  { %s2507_s22 = smov 0   ;;  %s2509_s23 = smov 0  }
   0x5 LB: > { %s2000_s4 = sadd.s32 4294967295, %s2464_s23   ;;  %s2001_s24 = sadd.s32 4294967294, %s2464_s23   ;;  %s2464_s23 = sphi %s2509_s23, %s3410_s23   ;;  %s2460_s22 = sphi %s2507_s22, %s3409_s22   ;;  %s2456_s21 = sphi %s2505_s21, %s3408_s21   ;;  %s2452_s20 = sphi %s2503_s20, %s3407_s20  }
   0x6   : > { %s2526_s25 = sadd.s32 1, %s2464_s23   ;;  %s141_s26 = sadd.s32 1, %s2460_s22 }
   0x7   : > { %s138_s27 = ssub.s32 %s2464_s23, %s2526_s25  ;;  %p151_p0 = scmp.ne.s32.totalorder %s2460_s22, %s2456_s21 }
   0x8   : > { %p139_p1 = scmp.eq.s32.totalorder %s138_s27, 0  ;;  %p152_p2 = scmp.eq.s32.totalorder %s2000_s4, 1 }
   0x9   : > { %p157_p3 = scmp.ne.s32.totalorder %s2456_s21, %s2452_s20  ;;  %p158_p4 = scmp.eq.s32.totalorder %s2001_s24, 1 }
   0xa   : > { %s2536_s28 = scalar_select %p139_p1, %s2460_s22, %s141_s26  }
   0xb   : > { %p2538_p5 = por %p152_p2, %p151_p0  ;;  %p2542_p6 = por %p158_p4, %p157_p3 }
   0xc   : > { %p2004_p7 = scmp.ge.s32.totalorder %s2464_s23, 1  ;;  %p203_p8 = scmp.lt.s32.totalorder %s2464_s23, 3 }
   0xe   : > { %p204_p9 = pnand %p2004_p7, %p203_p8 }
  0x10   : > { %207 = sbr.rel (%p204_p9) target bundleno = 662 (0x296), region = 40 }
  0x15   : > { %s2548_s6 = sshll.u32 %s2000_s4, 6  ;;  %vm391_vm0 = vcmask 15360   ;;  %v2553_v0 = vld [vmem:[%s3367_s2 + $0x40] sm:$0xff]  ;;  %v2466_v35 = vmov 0   ;;  %v1280_v52 = vld [vmem:[%s3368_s3 + $0x18] sm:$0xff]  ;;  %v1278_v53 = vld [vmem:[%s3368_s3 + $0x8] sm:$0xff] }
  0x16   : > { %p237_p10 = scmp.lt.s32.totalorder %s2548_s6, 127  ;;  %2208 = vmatprep.mubr.msk.f32.mxu0 %vm391_vm0, %v2553_v0  ;;  %2254 = vmatprep.mubr.msk.f32.mxu1 %vm391_vm0, %v2553_v0  ;;  %v1279_v54 = vld [vmem:[%s3368_s3 + $0x10] sm:$0xff]  ;;  %v1277_v59 = vld [vmem:[%s3368_s3] sm:$0xff]  ;;  %v1516_v60 = vld [vmem:[%s3368_s3 + $0x48] sm:$0xff]  ;;  %vm819_vm1 = vcmask 138240   ;;  %vm1547_vm2 = vcmask 1040384   ;;  %s1928_s27 = scalar_lea.hbm %s3370_s5, %s2548_s6 }
  0x17   : > { %2402 = vset.pattern.permute.xlu0 %v2466_v35  ;;  %2403 = vset.pattern.permute.xlu1 %v2466_v35  ;;  %vm1347_vm3 = vcmask 261120   ;;  %s1875_s4 = sld [smem:[#allocation2]]  ;;  %s2469_s11 = smov [#allocation3]  }
  0x18   : > { %s2561_s9 = scalar_select %p237_p10, %s2548_s6, 127  ;;  %1298 = vperm.xlu0 %2402, %v1280_v52   ;;  %1288 = vperm.xlu1 %2403, %v1278_v53  }
  0x19   : > { %s2408_s12 = sshll.u32 %s2469_s11, 4  ;;  %s2409_s12 = int_to_ptr.vmem [resolvable:$false] %s2408_s12 }
  0x1a   : > { %s2007_s10 = sshll.u32 %s2561_s9, 3  ;;  %s233_s9 = sand.u32 1, %s2456_s21  }
  0x1b   : > { %s2569_s13 = scalar_lea.vmem %s3366_s1, %s2007_s10  ;;  %s2717_s16 = scalar_lea.vmem %s3365_s0, %s2007_s10 }
  0x1c   : > { %v358_v1 = vld [vmem:[%s2569_s13 + $0xf8] sm:$0xff]  ;;  %v357_v5 = vld [vmem:[%s2569_s13 + $0xf0] sm:$0xff]  ;;  %v356_v9 = vld [vmem:[%s2569_s13 + $0xe8] sm:$0xff]  ;;  %1293 = vperm.xlu0 %2402, %v1279_v54   ;;  %1283 = vperm.xlu1 %2403, %v1277_v59   ;;  %s2005_s10 = sshll.u32 %s233_s9, 2  ;;  %s1916_s7 = scalar_lea.sflag [#allocation4], %s233_s9 }
  0x1d   : > { %v390_v2 = vld [vmem:[%s2569_s13 + $0x1f8] sm:$0xff]  ;;  %2176 = vmatprep.subr.msk.mxu0 %vm391_vm0, %v358_v1  ;;  %v389_v6 = vld [vmem:[%s2569_s13 + $0x1f0] sm:$0xff]  ;;  %v388_v10 = vld [vmem:[%s2569_s13 + $0x1e8] sm:$0xff]  ;;  %s2410_s14 = scalar_lea.vmem %s2409_s12, 128 }
  0x1e   : > { %v342_v3 = vld [vmem:[%s2569_s13 + $0x78] sm:$0xff]  ;;  %2222 = vmatprep.subr.msk.mxu1 %vm391_vm0, %v390_v2  ;;  %v341_v7 = vld [vmem:[%s2569_s13 + $0x70] sm:$0xff]  ;;  %v340_v11 = vld [vmem:[%s2569_s13 + $0x68] sm:$0xff] }
  0x1f   : > { %v374_v4 = vld [vmem:[%s2569_s13 + $0x178] sm:$0xff]  ;;  %2177 = vmatpush3.xpose.msk.msra.mxu0 %vm391_vm0, %v342_v3  ;;  %v373_v8 = vld [vmem:[%s2569_s13 + $0x170] sm:$0xff]  ;;  %v372_v12 = vld [vmem:[%s2569_s13 + $0x168] sm:$0xff] }
  0x20   : > { %2223 = vmatpush3.xpose.msk.msra.mxu1 %vm391_vm0, %v374_v4  ;;  %2178 = vmatprep.subr.msk.mxu0 %vm391_vm0, %v357_v5  ;;  %v355_v13 = vld [vmem:[%s2569_s13 + $0xe0] sm:$0xff]  ;;  %v354_v17 = vld [vmem:[%s2569_s13 + $0xd8] sm:$0xff]  ;;  %v353_v21 = vld [vmem:[%s2569_s13 + $0xd0] sm:$0xff] }
  0x21   : > { %2224 = vmatprep.subr.msk.mxu1 %vm391_vm0, %v389_v6  ;;  %v387_v14 = vld [vmem:[%s2569_s13 + $0x1e0] sm:$0xff]  ;;  %v386_v18 = vld [vmem:[%s2569_s13 + $0x1d8] sm:$0xff]  ;;  %v385_v22 = vld [vmem:[%s2569_s13 + $0x1d0] sm:$0xff]  ;;  %1521 = vperm.xlu0 %2402, %v1516_v60  }
  0x22   : > { %v339_v15 = vld [vmem:[%s2569_s13 + $0x60] sm:$0xff]  ;;  %v338_v19 = vld [vmem:[%s2569_s13 + $0x58] sm:$0xff]  ;;  %v337_v23 = vld [vmem:[%s2569_s13 + $0x50] sm:$0xff] }
  0x23   : > { %2179 = vmatpush3.xpose.msk.msra.mxu0 %vm391_vm0, %v341_v7  ;;  %v371_v16 = vld [vmem:[%s2569_s13 + $0x160] sm:$0xff]  ;;  %v370_v20 = vld [vmem:[%s2569_s13 + $0x158] sm:$0xff]  ;;  %v369_v24 = vld [vmem:[%s2569_s13 + $0x150] sm:$0xff] }
  0x24   : > { %2225 = vmatpush3.xpose.msk.msra.mxu1 %vm391_vm0, %v373_v8  ;;  %2180 = vmatprep.subr.msk.mxu0 %vm391_vm0, %v356_v9  ;;  %v352_v25 = vld [vmem:[%s2569_s13 + $0xc8] sm:$0xff]  ;;  %v351_v29 = vld [vmem:[%s2569_s13 + $0xc0] sm:$0xff]  ;;  %v350_v33 = vld [vmem:[%s2569_s13 + $0xb8] sm:$0xff] }
  0x25   : > { %2226 = vmatprep.subr.msk.mxu1 %vm391_vm0, %v388_v10  ;;  %v384_v26 = vld [vmem:[%s2569_s13 + $0x1c8] sm:$0xff]  ;;  %v383_v30 = vld [vmem:[%s2569_s13 + $0x1c0] sm:$0xff]  ;;  %v382_v34 = vld [vmem:[%s2569_s13 + $0x1b8] sm:$0xff] }
  0x26   : > { %v336_v27 = vld [vmem:[%s2569_s13 + $0x48] sm:$0xff]  ;;  %v335_v31 = vld [vmem:[%s2569_s13 + $0x40] sm:$0xff]  ;;  %v334_v36 = vld [vmem:[%s2569_s13 + $0x38] sm:$0xff] }
  0x27   : > { %2181 = vmatpush3.xpose.msk.msra.mxu0 %vm391_vm0, %v340_v11  ;;  %v368_v28 = vld [vmem:[%s2569_s13 + $0x148] sm:$0xff]  ;;  %v367_v32 = vld [vmem:[%s2569_s13 + $0x140] sm:$0xff]  ;;  %v366_v37 = vld [vmem:[%s2569_s13 + $0x138] sm:$0xff] }
  0x28   : > { %2227 = vmatpush3.xpose.msk.msra.mxu1 %vm391_vm0, %v372_v12  ;;  %2182 = vmatprep.subr.msk.mxu0 %vm391_vm0, %v355_v13  ;;  %v349_v38 = vld [vmem:[%s2569_s13 + $0xb0] sm:$0xff]  ;;  %v348_v42 = vld [vmem:[%s2569_s13 + $0xa8] sm:$0xff]  ;;  %v347_v46 = vld [vmem:[%s2569_s13 + $0xa0] sm:$0xff] }
  0x29   : > { %2228 = vmatprep.subr.msk.mxu1 %vm391_vm0, %v387_v14  ;;  %v381_v39 = vld [vmem:[%s2569_s13 + $0x1b0] sm:$0xff]  ;;  %v380_v43 = vld [vmem:[%s2569_s13 + $0x1a8] sm:$0xff]  ;;  %v379_v47 = vld [vmem:[%s2569_s13 + $0x1a0] sm:$0xff] }
  0x2a   : > { %v333_v40 = vld [vmem:[%s2569_s13 + $0x30] sm:$0xff]  ;;  %v332_v44 = vld [vmem:[%s2569_s13 + $0x28] sm:$0xff]  ;;  %v331_v48 = vld [vmem:[%s2569_s13 + $0x20] sm:$0xff] }
  0x2b   : > { %2183 = vmatpush3.xpose.msk.msra.mxu0 %vm391_vm0, %v339_v15  ;;  %v365_v41 = vld [vmem:[%s2569_s13 + $0x130] sm:$0xff]  ;;  %v364_v45 = vld [vmem:[%s2569_s13 + $0x128] sm:$0xff]  ;;  %v363_v49 = vld [vmem:[%s2569_s13 + $0x120] sm:$0xff] }
  0x2c   : > { %2229 = vmatpush3.xpose.msk.msra.mxu1 %vm391_vm0, %v371_v16  ;;  %2184 = vmatprep.subr.msk.mxu0 %vm391_vm0, %v354_v17  ;;  %v346_v50 = vld [vmem:[%s2569_s13 + $0x98] sm:$0xff]  ;;  %v345_v57 = vld [vmem:[%s2569_s13 + $0x90] sm:$0xff]  ;;  %v344_v63 = vld [vmem:[%s2569_s13 + $0x88] sm:$0xff] }
  0x2d   : > { %2230 = vmatprep.subr.msk.mxu1 %vm391_vm0, %v386_v18  ;;  %v378_v51 = vld [vmem:[%s2569_s13 + $0x198] sm:$0xff]  ;;  %v377_v58 = vld [vmem:[%s2569_s13 + $0x190] sm:$0xff]  ;;  %v376_v1 = vld [vmem:[%s2569_s13 + $0x188] sm:$0xff] }
  0x2e   : > { %v330_v55 = vld [vmem:[%s2569_s13 + $0x18] sm:$0xff]  ;;  %v329_v61 = vld [vmem:[%s2569_s13 + $0x10] sm:$0xff]  ;;  %v328_v4 = vld [vmem:[%s2569_s13 + $0x8] sm:$0xff] }
  0x2f   : > { %2185 = vmatpush3.xpose.msk.msra.mxu0 %vm391_vm0, %v338_v19  ;;  %v362_v56 = vld [vmem:[%s2569_s13 + $0x118] sm:$0xff]  ;;  %v361_v62 = vld [vmem:[%s2569_s13 + $0x110] sm:$0xff]  ;;  %v360_v5 = vld [vmem:[%s2569_s13 + $0x108] sm:$0xff] }
  0x30   : > { %2231 = vmatpush3.xpose.msk.msra.mxu1 %vm391_vm0, %v370_v20  ;;  %2186 = vmatprep.subr.msk.mxu0 %vm391_vm0, %v353_v21  ;;  %v1517_v2 = vld [vmem:[%s3368_s3 + $0x50] sm:$0xff]  ;;  %v1518_v3 = vld [vmem:[%s3368_s3 + $0x58] sm:$0x1]  ;;  %v343_v6 = vld [vmem:[%s2569_s13 + $0x80] sm:$0xff] }
  0x31   : > { %2232 = vmatprep.subr.msk.mxu1 %vm391_vm0, %v385_v22  ;;  %v375_v7 = vld [vmem:[%s2569_s13 + $0x180] sm:$0xff]  ;;  %1526 = vperm.xlu1 %2403, %v1517_v2   ;;  %v1247_v8 = vld [vmem:[%s3368_s3 + $0x30] sm:$0xff]  ;;  %v1248_v9 = vld [vmem:[%s3368_s3 + $0x38] sm:$0xff] }
  0x32   : > { %1531 = vperm.xlu0 %2402, %v1518_v3   ;;  %v327_v10 = vld [vmem:[%s2569_s13] sm:$0xff]  ;;  %v287_v12 = vld [vmem:[%s2717_s16 + $0xf8] sm:$0xff]  ;;  %v286_v17 = vld [vmem:[%s2717_s16 + $0xf0] sm:$0xff] }
  0x33   : > { %2187 = vmatpush3.xpose.msk.msra.mxu0 %vm391_vm0, %v337_v23  ;;  %v359_v11 = vld [vmem:[%s2569_s13 + $0x100] sm:$0xff]  ;;  %v319_v13 = vld [vmem:[%s2717_s16 + $0x1f8] sm:$0xff]  ;;  %v318_v18 = vld [vmem:[%s2717_s16 + $0x1f0] sm:$0xff]  ;;  %s235_s13 = scalar_lea.vmem [#allocation3], %s2005_s10 }
  0x34   : > { %2233 = vmatpush3.xpose.msk.msra.mxu1 %vm391_vm0, %v369_v24  ;;  %2188 = vmatprep.subr.msk.mxu0 %vm391_vm0, %v352_v25  ;;  %v1249_v14 = vld [vmem:[%s3368_s3 + $0x40] sm:$0x1]  ;;  %v271_v15 = vld [vmem:[%s2717_s16 + $0x78] sm:$0xff]  ;;  %v321_v19 = vld [vmem:[%s3367_s2 + $0x48] sm:$0xff] }
  0x35   : > { %2234 = vmatprep.subr.msk.mxu1 %vm391_vm0, %v384_v26  ;;  %1252 = vperm.xlu1 %2403, %v1247_v8   ;;  %v303_v16 = vld [vmem:[%s2717_s16 + $0x178] sm:$0xff]  ;;  %v270_v20 = vld [vmem:[%s2717_s16 + $0x70] sm:$0xff]  ;;  %v285_v22 = vld [vmem:[%s2717_s16 + $0xe8] sm:$0xff] }
  0x36   : > { %1257 = vperm.xlu0 %2402, %v1248_v9   ;;  %v302_v21 = vld [vmem:[%s2717_s16 + $0x170] sm:$0xff]  ;;  %v269_v24 = vld [vmem:[%s2717_s16 + $0x68] sm:$0xff]  ;;  %v284_v26 = vld [vmem:[%s2717_s16 + $0xe0] sm:$0xff] }
  0x37   : > { %2189 = vmatpush3.xpose.msk.msra.mxu0 %vm391_vm0, %v336_v27  ;;  %v322_v23 = vld [vmem:[%s3367_s2 + $0x50] sm:$0xff]  ;;  %v301_v25 = vld [vmem:[%s2717_s16 + $0x168] sm:$0xff]  ;;  %v316_v27 = vld [vmem:[%s2717_s16 + $0x1e0] sm:$0xff] }
  0x38   : > { %2235 = vmatpush3.xpose.msk.msra.mxu1 %vm391_vm0, %v368_v28  ;;  %2190 = vmatprep.subr.msk.mxu0 %vm391_vm0, %v351_v29  ;;  %v323_v28 = vld [vmem:[%s3367_s2 + $0x58] sm:$0xff]  ;;  %v268_v29 = vld [vmem:[%s2717_s16 + $0x60] sm:$0xff]  ;;  %v278_v59 = vld [vmem:[%s2717_s16 + $0xb0] sm:$0xff] }
  0x39   : > { %2236 = vmatprep.subr.msk.mxu1 %vm391_vm0, %v383_v30  ;;  %1262 = vperm.xlu1 %2403, %v1249_v14   ;;  %v300_v30 = vld [vmem:[%s2717_s16 + $0x160] sm:$0xff]  ;;  %v299_v35 = vld [vmem:[%s2717_s16 + $0x158] sm:$0xff]  ;;  %v310_v60 = vld [vmem:[%s2717_s16 + $0x1b0] sm:$0xff] }
  0x3a   : > { %v296_v52 = vld [vmem:[%s2717_s16 + $0x140] sm:$0xff]  ;;  %v279_v53 = vld [vmem:[%s2717_s16 + $0xb8] sm:$0xff]  ;;  %v277_v2 = vld [vmem:[%s2717_s16 + $0xa8] sm:$0xff] }
  0x3b   : > { %2191 = vmatpush3.xpose.msk.msra.mxu0 %vm391_vm0, %v335_v31  ;;  %v283_v31 = vld [vmem:[%s2717_s16 + $0xd8] sm:$0xff]  ;;  %v309_v3 = vld [vmem:[%s2717_s16 + $0x1a8] sm:$0xff]  ;;  %v276_v8 = vld [vmem:[%s2717_s16 + $0xa0] sm:$0xff] }
  0x3c   : > { %2237 = vmatpush3.xpose.msk.msra.mxu1 %vm391_vm0, %v367_v32  ;;  %2192 = vmatprep.subr.msk.mxu0 %vm391_vm0, %v350_v33  ;;  %v315_v32 = vld [vmem:[%s2717_s16 + $0x1d8] sm:$0xff]  ;;  %v324_v33 = vld [vmem:[%s3367_s2 + $0x60] sm:$0xff] }
  0x3d   : > { %2238 = vmatprep.subr.msk.mxu1 %vm391_vm0, %v382_v34  ;;  %v267_v34 = vld [vmem:[%s2717_s16 + $0x58] sm:$0xff]  ;;  %v308_v9 = vld [vmem:[%s2717_s16 + $0x1a0] sm:$0xff] }
  0x3e   : > { %v311_v54 = vld [vmem:[%s2717_s16 + $0x1b8] sm:$0xff] }
  0x3f   : > { %2193 = vmatpush3.xpose.msk.msra.mxu0 %vm391_vm0, %v334_v36  ;;  %v282_v36 = vld [vmem:[%s2717_s16 + $0xd0] sm:$0xff]  ;;  %v275_v14 = vld [vmem:[%s2717_s16 + $0x98] sm:$0xff] }
  0x40   : > { %2239 = vmatpush3.xpose.msk.msra.mxu1 %vm391_vm0, %v366_v37  ;;  %2194 = vmatprep.subr.msk.mxu0 %vm391_vm0, %v349_v38  ;;  %v314_v37 = vld [vmem:[%s2717_s16 + $0x1d0] sm:$0xff]  ;;  %v325_v38 = vld [vmem:[%s3367_s2 + $0x68] sm:$0xff] }
  0x41   : > { %2240 = vmatprep.subr.msk.mxu1 %vm391_vm0, %v381_v39  ;;  %v266_v39 = vld [vmem:[%s2717_s16 + $0x50] sm:$0xff] }
  0x43   : > { %2195 = vmatpush3.xpose.msk.msra.mxu0 %vm391_vm0, %v333_v40  ;;  %v298_v40 = vld [vmem:[%s2717_s16 + $0x150] sm:$0xff] }
  0x44   : > { %2241 = vmatpush3.xpose.msk.msra.mxu1 %vm391_vm0, %v365_v41  ;;  %2196 = vmatprep.subr.msk.mxu0 %vm391_vm0, %v348_v42  ;;  %v281_v41 = vld [vmem:[%s2717_s16 + $0xc8] sm:$0xff] }
  0x45   : > { %2242 = vmatprep.subr.msk.mxu1 %vm391_vm0, %v380_v43  ;;  %v313_v42 = vld [vmem:[%s2717_s16 + $0x1c8] sm:$0xff]  ;;  %v326_v43 = vld [vmem:[%s3367_s2 + $0x70] sm:$0xff] }
  0x47   : > { %2197 = vmatpush3.xpose.msk.msra.mxu0 %vm391_vm0, %v332_v44  ;;  %v265_v44 = vld [vmem:[%s2717_s16 + $0x48] sm:$0xff] }
  0x48   : > { %2243 = vmatpush3.xpose.msk.msra.mxu1 %vm391_vm0, %v364_v45  ;;  %2198 = vmatprep.subr.msk.mxu0 %vm391_vm0, %v347_v46  ;;  %v297_v45 = vld [vmem:[%s2717_s16 + $0x148] sm:$0xff]  ;;  %v280_v46 = vld [vmem:[%s2717_s16 + $0xc0] sm:$0xff] }
  0x49   : > { %2244 = vmatprep.subr.msk.mxu1 %vm391_vm0, %v379_v47  ;;  %v312_v47 = vld [vmem:[%s2717_s16 + $0x1c0] sm:$0xff] }
  0x4b   : > { %2199 = vmatpush3.xpose.msk.msra.mxu0 %vm391_vm0, %v331_v48  ;;  %v2841_v48 = vld [vmem:[%s3367_s2] sm:$0xff] }
  0x4c   : > { %2245 = vmatpush3.xpose.msk.msra.mxu1 %vm391_vm0, %v363_v49  ;;  %2200 = vmatprep.subr.msk.mxu0 %vm391_vm0, %v346_v50  ;;  %v1595_v49 = vld [vmem:[%s3368_s3 + $0x78] sm:$0xff]  ;;  %v1596_v50 = vld [vmem:[%s3368_s3 + $0x80] sm:$0xff] }
  0x4d   : > { %2246 = vmatprep.subr.msk.mxu1 %vm391_vm0, %v378_v51  ;;  %v264_v51 = vld [vmem:[%s2717_s16 + $0x40] sm:$0xff]  ;;  %1600 = vperm.xlu0 %2402, %v1595_v49  }
  0x4e   : > { %1605 = vperm.xlu1 %2403, %v1596_v50  }
  0x4f   : > { %2201 = vmatpush3.xpose.msk.msra.mxu0 %vm391_vm0, %v330_v55  ;;  %v1597_v55 = vld [vmem:[%s3368_s3 + $0x88] sm:$0x1] }
  0x50   : > { %2247 = vmatpush3.xpose.msk.msra.mxu1 %vm391_vm0, %v362_v56  ;;  %2202 = vmatprep.subr.msk.mxu0 %vm391_vm0, %v345_v57  ;;  %v1637_v56 = vld [vmem:[%s3368_s3 + $0x60] sm:$0xff]  ;;  %v263_v57 = vld [vmem:[%s2717_s16 + $0x38] sm:$0xff] }
  0x51   : > { %2248 = vmatprep.subr.msk.mxu1 %vm391_vm0, %v377_v58  ;;  %v295_v58 = vld [vmem:[%s2717_s16 + $0x138] sm:$0xff]  ;;  %1610 = vperm.xlu0 %2402, %v1597_v55  }
  0x52   : > { %1642 = vperm.xlu1 %2403, %v1637_v56  }
  0x53   : > { %2203 = vmatpush3.xpose.msk.msra.mxu0 %vm391_vm0, %v329_v61  ;;  %v1638_v61 = vld [vmem:[%s3368_s3 + $0x68] sm:$0xff] }
  0x54   : > { %2249 = vmatpush3.xpose.msk.msra.mxu1 %vm391_vm0, %v361_v62  ;;  %2204 = vmatprep.subr.msk.mxu0 %vm391_vm0, %v344_v63  ;;  %v1639_v62 = vld [vmem:[%s3368_s3 + $0x70] sm:$0x1] }
  0x55   : > { %2250 = vmatprep.subr.msk.mxu1 %vm391_vm0, %v376_v1  ;;  %v262_v63 = vld [vmem:[%s2717_s16 + $0x30] sm:$0xff]  ;;  %1647 = vperm.xlu0 %2402, %v1638_v61  }
  0x56   : > { %v294_v1 = vld [vmem:[%s2717_s16 + $0x130] sm:$0xff]  ;;  %1652 = vperm.xlu1 %2403, %v1639_v62  }
  0x57   : > { %2205 = vmatpush3.xpose.msk.msra.mxu0 %vm391_vm0, %v328_v4  ;;  %v1715_v4 = vld [vmem:[%s3368_s3 + $0x90] sm:$0xff] }
  0x58   : > { %2251 = vmatpush3.xpose.msk.msra.mxu1 %vm391_vm0, %v360_v5  ;;  %2206 = vmatprep.subr.msk.mxu0 %vm391_vm0, %v343_v6  ;;  %v1716_v5 = vld [vmem:[%s3368_s3 + $0x98] sm:$0xff]  ;;  %v261_v6 = vld [vmem:[%s2717_s16 + $0x28] sm:$0xff] }
  0x59   : > { %2252 = vmatprep.subr.msk.mxu1 %vm391_vm0, %v375_v7  ;;  %v293_v7 = vld [vmem:[%s2717_s16 + $0x128] sm:$0xff]  ;;  %1720 = vperm.xlu0 %2402, %v1715_v4  }
  0x5a   : > { %1725 = vperm.xlu1 %2403, %v1716_v5  }
  0x5b   : > { %2207 = vmatpush3.xpose.msk.msra.mxu0 %vm391_vm0, %v327_v10  ;;  %v1717_v10 = vld [vmem:[%s3368_s3 + $0xa0] sm:$0x1] }
  0x5c   : > { %2253 = vmatpush3.xpose.msk.msra.mxu1 %vm391_vm0, %v359_v11  ;;  %2268 = vmatprep.subr.msk.mxu0 %vm819_vm1, %v287_v12  ;;  %v1335_v11 = vld [vmem:[%s3368_s3 + $0x20] sm:$0xff] }
  0x5d   : > { %2314 = vmatprep.subr.msk.mxu1 %vm819_vm1, %v319_v13  ;;  %v260_v12 = vld [vmem:[%s2717_s16 + $0x20] sm:$0xff]  ;;  %1730 = vperm.xlu0 %2402, %v1717_v10  }
  0x5e   : > { %2209 = vmatmul.mubr.msk.f32.vlgmr.msra.gmra.mxu0 %vm391_vm0, %v2553_v0  ;;  %v292_v13 = vld [vmem:[%s2717_s16 + $0x120] sm:$0xff]  ;;  %1339 = vperm.xlu1 %2403, %v1335_v11  }
  0x5f   : > { %2255 = vmatmul.mubr.msk.f32.vlgmr.msra.gmra.mxu1 %vm391_vm0, %v2553_v0  ;;  %2269 = vmatpush3.xpose.msk.msra.mxu0 %vm819_vm1, %v271_v15  ;;  %v317_v0 = vld [vmem:[%s2717_s16 + $0x1e8] sm:$0xff]  ;;  %v307_v15 = vld [vmem:[%s2717_s16 + $0x198] sm:$0xff] }
  0x60   : > { %2315 = vmatpush3.xpose.msk.msra.mxu1 %vm819_vm1, %v303_v16  ;;  %2270 = vmatprep.subr.msk.mxu0 %vm819_vm1, %v286_v17  ;;  %v1336_v16 = vld [vmem:[%s3368_s3 + $0x28] sm:$0xff]  ;;  %v1805_v17 = vld [vmem:[%s3368_s3 + $0xb8] sm:$0xff] }
  0x61   : > { %2316 = vmatprep.subr.msk.mxu1 %vm819_vm1, %v318_v18  ;;  %2210 = vmatprep.mubr.msk.f32.mxu0 %vm391_vm0, %v321_v19  ;;  %v259_v18 = vld [vmem:[%s2717_s16 + $0x18] sm:$0xff] }
  0x62   : > { %2256 = vmatprep.mubr.msk.f32.mxu1 %vm391_vm0, %v321_v19  ;;  %2211 = vmatmul.mubr.msk.f32.gmra.mxu0 %vm391_vm0, %v321_v19 }
  0x63   : > { %2257 = vmatmul.mubr.msk.f32.gmra.mxu1 %vm391_vm0, %v321_v19  ;;  %2271 = vmatpush3.xpose.msk.msra.mxu0 %vm819_vm1, %v270_v20  ;;  %v291_v19 = vld [vmem:[%s2717_s16 + $0x118] sm:$0xff]  ;;  %v274_v20 = vld [vmem:[%s2717_s16 + $0x90] sm:$0xff] }
  0x64   : > { %2317 = vmatpush3.xpose.msk.msra.mxu1 %vm819_vm1, %v302_v21  ;;  %2272 = vmatprep.subr.msk.mxu0 %vm819_vm1, %v285_v22  ;;  %v306_v21 = vld [vmem:[%s2717_s16 + $0x190] sm:$0xff]  ;;  %v1806_v22 = vld [vmem:[%s3368_s3 + $0xc0] sm:$0xff] }
  0x65   : > { %2318 = vmatprep.subr.msk.mxu1 %vm819_vm1, %v317_v0  ;;  %2212 = vmatprep.mubr.msk.f32.mxu0 %vm391_vm0, %v322_v23  ;;  %v1807_v0 = vld [vmem:[%s3368_s3 + $0xc8] sm:$0x1] }
  0x66   : > { %2258 = vmatprep.mubr.msk.f32.mxu1 %vm391_vm0, %v322_v23  ;;  %2213 = vmatmul.mubr.msk.f32.gmra.mxu0 %vm391_vm0, %v322_v23 }
  0x67   : > { %2259 = vmatmul.mubr.msk.f32.gmra.mxu1 %vm391_vm0, %v322_v23  ;;  %2273 = vmatpush3.xpose.msk.msra.mxu0 %vm819_vm1, %v269_v24  ;;  %v258_v23 = vld [vmem:[%s2717_s16 + $0x10] sm:$0xff] }
  0x68   : > { %2319 = vmatpush3.xpose.msk.msra.mxu1 %vm819_vm1, %v301_v25  ;;  %2274 = vmatprep.subr.msk.mxu0 %vm819_vm1, %v284_v26  ;;  %v290_v24 = vld [vmem:[%s2717_s16 + $0x110] sm:$0xff]  ;;  %v273_v25 = vld [vmem:[%s2717_s16 + $0x88] sm:$0xff] }
  0x69   : > { %2320 = vmatprep.subr.msk.mxu1 %vm819_vm1, %v316_v27  ;;  %2214 = vmatprep.mubr.msk.f32.mxu0 %vm391_vm0, %v323_v28  ;;  %v305_v26 = vld [vmem:[%s2717_s16 + $0x188] sm:$0xff] }
  0x6a   : > { %2260 = vmatprep.mubr.msk.f32.mxu1 %vm391_vm0, %v323_v28  ;;  %2215 = vmatmul.mubr.msk.f32.gmra.mxu0 %vm391_vm0, %v323_v28  ;;  %v1757_v27 = vld [vmem:[%s3368_s3 + $0xa8] sm:$0xff] }
  0x6b   : > { %2261 = vmatmul.mubr.msk.f32.gmra.mxu1 %vm391_vm0, %v323_v28  ;;  %2275 = vmatpush3.xpose.msk.msra.mxu0 %vm819_vm1, %v268_v29  ;;  %v1758_v28 = vld [vmem:[%s3368_s3 + $0xb0] sm:$0xff]  ;;  %v257_v29 = vld [vmem:[%s2717_s16 + $0x8] sm:$0xff] }
  0x6c   : > { %2321 = vmatpush3.xpose.msk.msra.mxu1 %vm819_vm1, %v300_v30  ;;  %2276 = vmatprep.subr.msk.mxu0 %vm819_vm1, %v283_v31  ;;  %v289_v30 = vld [vmem:[%s2717_s16 + $0x108] sm:$0xff]  ;;  %v272_v31 = vld [vmem:[%s2717_s16 + $0x80] sm:$0xff] }
  0x6d   : > { %2322 = vmatprep.subr.msk.mxu1 %vm819_vm1, %v315_v32  ;;  %2216 = vmatprep.mubr.msk.f32.mxu0 %vm391_vm0, %v324_v33  ;;  %v304_v32 = vld [vmem:[%s2717_s16 + $0x180] sm:$0xff] }
  0x6e   : > { %2262 = vmatprep.mubr.msk.f32.mxu1 %vm391_vm0, %v324_v33  ;;  %2217 = vmatmul.mubr.msk.f32.gmra.mxu0 %vm391_vm0, %v324_v33 }
  0x6f   : > { %2263 = vmatmul.mubr.msk.f32.gmra.mxu1 %vm391_vm0, %v324_v33  ;;  %2277 = vmatpush3.xpose.msk.msra.mxu0 %vm819_vm1, %v267_v34  ;;  %v256_v33 = vld [vmem:[%s2717_s16] sm:$0xff] }
  0x70   : > { %2323 = vmatpush3.xpose.msk.msra.mxu1 %vm819_vm1, %v299_v35  ;;  %2278 = vmatprep.subr.msk.mxu0 %vm819_vm1, %v282_v36  ;;  %v288_v34 = vld [vmem:[%s2717_s16 + $0x100] sm:$0xff]  ;;  %v250_v35 = vld [vmem:[%s3367_s2 + $0x8] sm:$0xff]  ;;  %v251_v36 = vld [vmem:[%s3367_s2 + $0x10] sm:$0xff]  ;;  %s1930_s16 = sshll.u32 %s235_s13, 4  ;;  %s1931_s16 = int_to_ptr.vmem [resolvable:$true] %s1930_s16 }
  0x71   : > { %2324 = vmatprep.subr.msk.mxu1 %vm819_vm1, %v314_v37  ;;  %2218 = vmatprep.mubr.msk.f32.mxu0 %vm391_vm0, %v325_v38  ;;  %v252_v37 = vld [vmem:[%s3367_s2 + $0x18] sm:$0xff]  ;;  %s2404_s8 = scalar_lea.vmem %s1931_s16, 64  ;;  %p2411_p0 = scmp.lt.s32.totalorder %s1931_s16, %s2409_s12 }
  0x72   : > { %2264 = vmatprep.mubr.msk.f32.mxu1 %vm391_vm0, %v325_v38  ;;  %2219 = vmatmul.mubr.msk.f32.gmra.mxu0 %vm391_vm0, %v325_v38  ;;  %p2405_p11 = scmp.ne.s32.totalorder %s1931_s16, %s2404_s8  ;;  %p2412_p1 = scmp.lt.s32.totalorder %s2410_s14, %s2404_s8 }
  0x73   : > { %2265 = vmatmul.mubr.msk.f32.gmra.mxu1 %vm391_vm0, %v325_v38  ;;  %2279 = vmatpush3.xpose.msk.msra.mxu0 %vm819_vm1, %v266_v39  ;;  %v253_v38 = vld [vmem:[%s3367_s2 + $0x20] sm:$0xff]  ;;  %v254_v39 = vld [vmem:[%s3367_s2 + $0x28] sm:$0xff] }
  0x74   : > { %2325 = vmatpush3.xpose.msk.msra.mxu1 %vm819_vm1, %v298_v40  ;;  %2280 = vmatprep.subr.msk.mxu0 %vm819_vm1, %v281_v41  ;;  %v255_v40 = vld [vmem:[%s3367_s2 + $0x30] sm:$0xff]  ;;  %v3371_v41 = vmov 0.0   ;;  %p2406_p12 = pnand %p2405_p11, %p2538_p5  ;;  %p2413_p2 = por %p2412_p1, %p2411_p0 }
  0x75   : > { %2326 = vmatprep.subr.msk.mxu1 %vm819_vm1, %v313_v42  ;;  %2220 = vmatprep.mubr.msk.f32.mxu0 %vm391_vm0, %v326_v43 }
  0x76   : > { %2266 = vmatprep.mubr.msk.f32.mxu1 %vm391_vm0, %v326_v43  ;;  %2221 = vmatmul.mubr.msk.f32.gmra.mxu0 %vm391_vm0, %v326_v43  ;;  %p2407_p13 = pneg %p2406_p12 }
  0x77   : > { %2267 = vmatmul.mubr.msk.f32.gmra.mxu1 %vm391_vm0, %v326_v43  ;;  %2281 = vmatpush3.xpose.msk.msra.mxu0 %vm819_vm1, %v265_v44 }
  0x78   : > { %2327 = vmatpush3.xpose.msk.msra.mxu1 %vm819_vm1, %v297_v45  ;;  %2282 = vmatprep.subr.msk.mxu0 %vm819_vm1, %v280_v46  ;;  %p2414_p3 = pnand %p2413_p2, %p2407_p13 }
  0x79   : > { %2328 = vmatprep.subr.msk.mxu1 %vm819_vm1, %v312_v47  ;;  %2300 = vmatprep.mubr.msk.f32.mxu0 %vm819_vm1, %v2841_v48 }
  0x7a   : > { %2346 = vmatprep.mubr.msk.f32.mxu1 %vm819_vm1, %v2841_v48  ;;  %1344 = vperm.xlu0 %2402, %v1336_v16  }
  0x7b   : > { %2283 = vmatpush3.xpose.msk.msra.mxu0 %vm819_vm1, %v264_v51  ;;  %1810 = vperm.xlu1 %2403, %v1805_v17  }
  0x7c   : > { %2329 = vmatpush3.xpose.msk.msra.mxu1 %vm819_vm1, %v296_v52  ;;  %2284 = vmatprep.subr.msk.mxu0 %vm819_vm1, %v279_v53 }
  0x7d   : > { %2330 = vmatprep.subr.msk.mxu1 %vm819_vm1, %v311_v54 }
  0x7e   : > { %1815 = vperm.xlu0 %2402, %v1806_v22  }
  0x7f   : > { %2285 = vmatpush3.xpose.msk.msra.mxu0 %vm819_vm1, %v263_v57  ;;  %1820 = vperm.xlu1 %2403, %v1807_v0  }
  0x80   : > { %2331 = vmatpush3.xpose.msk.msra.mxu1 %vm819_vm1, %v295_v58  ;;  %2286 = vmatprep.subr.msk.mxu0 %vm819_vm1, %v278_v59 }
  0x81   : > { %2332 = vmatprep.subr.msk.mxu1 %vm819_vm1, %v310_v60 }
  0x82   : > { %1761 = vperm.xlu0 %2402, %v1757_v27  }
  0x83   : > { %2287 = vmatpush3.xpose.msk.msra.mxu0 %vm819_vm1, %v262_v63  ;;  %1766 = vperm.xlu1 %2403, %v1758_v28  }
  0x84   : > { %2333 = vmatpush3.xpose.msk.msra.mxu1 %vm819_vm1, %v294_v1  ;;  %2288 = vmatprep.subr.msk.mxu0 %vm819_vm1, %v277_v2 }
  0x85   : > { %2334 = vmatprep.subr.msk.mxu1 %vm819_vm1, %v309_v3 }
  0x87   : > { %2289 = vmatpush3.xpose.msk.msra.mxu0 %vm819_vm1, %v261_v6 }
  0x88   : > { %2335 = vmatpush3.xpose.msk.msra.mxu1 %vm819_vm1, %v293_v7  ;;  %2290 = vmatprep.subr.msk.mxu0 %vm819_vm1, %v276_v8 }
  0x89   : > { %2336 = vmatprep.subr.msk.mxu1 %vm819_vm1, %v308_v9 }
  0x8b   : > { %2291 = vmatpush3.xpose.msk.msra.mxu0 %vm819_vm1, %v260_v12 }
  0x8c   : > { %2337 = vmatpush3.xpose.msk.msra.mxu1 %vm819_vm1, %v292_v13  ;;  %2292 = vmatprep.subr.msk.mxu0 %vm819_vm1, %v275_v14 }
  0x8d   : > { %2338 = vmatprep.subr.msk.mxu1 %vm819_vm1, %v307_v15 }
  0x8f   : > { %2293 = vmatpush3.xpose.msk.msra.mxu0 %vm819_vm1, %v259_v18 }
  0x90   : > { %2339 = vmatpush3.xpose.msk.msra.mxu1 %vm819_vm1, %v291_v19  ;;  %2294 = vmatprep.subr.msk.mxu0 %vm819_vm1, %v274_v20 }
  0x91   : > { %2340 = vmatprep.subr.msk.mxu1 %vm819_vm1, %v306_v21 }
  0x93   : > { %2295 = vmatpush3.xpose.msk.msra.mxu0 %vm819_vm1, %v258_v23  ;;  %v3039_v3 = vpop.permute.xlu0 %1298  ;;  %v3041_v4 = vpop.permute.xlu1 %1288 }
  0x94   : > { %2341 = vmatpush3.xpose.msk.msra.mxu1 %vm819_vm1, %v290_v24  ;;  %2296 = vmatprep.subr.msk.mxu0 %vm819_vm1, %v273_v25  ;;  %3383 = vst [vmem:[#allocation6_spill] sm:$0xff] %v3039_v3 }
  0x95   : > { %2342 = vmatprep.subr.msk.mxu1 %vm819_vm1, %v305_v26 }
  0x97   : > { %2297 = vmatpush3.xpose.msk.msra.mxu0 %vm819_vm1, %v257_v29  ;;  %v3047_v7 = vpop.permute.xlu0 %1293  ;;  %v3053_v10 = vpop.permute.xlu1 %1283 }
  0x98   : > { %2343 = vmatpush3.xpose.msk.msra.mxu1 %vm819_vm1, %v289_v30  ;;  %2298 = vmatprep.subr.msk.mxu0 %vm819_vm1, %v272_v31 }
  0x99   : > { %2344 = vmatprep.subr.msk.mxu1 %vm819_vm1, %v304_v32 }
  0x9b   : > { %2299 = vmatpush3.xpose.msk.msra.mxu0 %vm819_vm1, %v256_v33 }
  0x9c   : > { %2345 = vmatpush3.xpose.msk.msra.mxu1 %vm819_vm1, %v288_v34  ;;  %v1522_v17 = vpop.permute.xlu0 %1521 }
  0x9e   : > { %2301 = vmatmul.mubr.msk.f32.vlgmr.msra.gmra.mxu0 %vm819_vm1, %v2841_v48 }
  0x9f   : > { %2347 = vmatmul.mubr.msk.f32.vlgmr.msra.gmra.mxu1 %vm819_vm1, %v2841_v48  ;;  %2302 = vmatprep.mubr.msk.f32.mxu0 %vm819_vm1, %v250_v35 }
  0xa0   : > { %2348 = vmatprep.mubr.msk.f32.mxu1 %vm819_vm1, %v250_v35 }
  0xa2   : > { %2303 = vmatmul.mubr.msk.f32.gmra.mxu0 %vm819_vm1, %v250_v35 }
  0xa3   : > { %2349 = vmatmul.mubr.msk.f32.gmra.mxu1 %vm819_vm1, %v250_v35  ;;  %2304 = vmatprep.mubr.msk.f32.mxu0 %vm819_vm1, %v251_v36 }
  0xa4   : > { %2350 = vmatprep.mubr.msk.f32.mxu1 %vm819_vm1, %v251_v36 }
  0xa6   : > { %2305 = vmatmul.mubr.msk.f32.gmra.mxu0 %vm819_vm1, %v251_v36 }
  0xa7   : > { %2351 = vmatmul.mubr.msk.f32.gmra.mxu1 %vm819_vm1, %v251_v36  ;;  %2306 = vmatprep.mubr.msk.f32.mxu0 %vm819_vm1, %v252_v37 }
  0xa8   : > { %2352 = vmatprep.mubr.msk.f32.mxu1 %vm819_vm1, %v252_v37 }
  0xaa   : > { %2307 = vmatmul.mubr.msk.f32.gmra.mxu0 %vm819_vm1, %v252_v37 }
  0xab   : > { %2353 = vmatmul.mubr.msk.f32.gmra.mxu1 %vm819_vm1, %v252_v37  ;;  %2308 = vmatprep.mubr.msk.f32.mxu0 %vm819_vm1, %v253_v38 }
  0xac   : > { %2354 = vmatprep.mubr.msk.f32.mxu1 %vm819_vm1, %v253_v38  ;;  %v1527_v22 = vpop.permute.xlu1 %1526 }
  0xad   : > { %v1532_v34 = vpop.permute.xlu0 %1531 }
  0xae   : > { %2309 = vmatmul.mubr.msk.f32.gmra.mxu0 %vm819_vm1, %v253_v38 }
  0xaf   : > { %2355 = vmatmul.mubr.msk.f32.gmra.mxu1 %vm819_vm1, %v253_v38  ;;  %2310 = vmatprep.mubr.msk.f32.mxu0 %vm819_vm1, %v254_v39 }
  0xb0   : > { %2356 = vmatprep.mubr.msk.f32.mxu1 %vm819_vm1, %v254_v39 }
  0xb2   : > { %2311 = vmatmul.mubr.msk.f32.gmra.mxu0 %vm819_vm1, %v254_v39 }
  0xb3   : > { %2357 = vmatmul.mubr.msk.f32.gmra.mxu1 %vm819_vm1, %v254_v39  ;;  %2312 = vmatprep.mubr.msk.f32.mxu0 %vm819_vm1, %v255_v40 }
  0xb4   : > { %2358 = vmatprep.mubr.msk.f32.mxu1 %vm819_vm1, %v255_v40 }
  0xb6   : > { %2313 = vmatmul.mubr.msk.f32.gmra.mxu0 %vm819_vm1, %v255_v40 }
  0xb7   : > { %2359 = vmatmul.mubr.msk.f32.gmra.mxu1 %vm819_vm1, %v255_v40  ;;  %1418 = vmatprep.mubr.f32.mxu0 %v3371_v41 }
  0xb8   : > { %1495 = vmatprep.mubr.f32.mxu1 %v3371_v41 }
 0x11e   : > { %v671_v42 = vpop.f32.mrf.mxu0 }
 0x11f   : > { %v778_v43 = vpop.f32.mrf.mxu1 }
 0x120   : > { %v673_v44 = vpop.f32.mrf.mxu0 }
 0x121   : > { %v780_v45 = vpop.f32.mrf.mxu1 }
 0x122   : > { %v677_v46 = vpop.f32.mrf.mxu0 }
 0x123   : > { %v784_v47 = vpop.f32.mrf.mxu1 }
 0x124   : > { %v679_v48 = vpop.f32.mrf.mxu0 }
 0x125   : > { %v786_v49 = vpop.f32.mrf.mxu1 }
 0x126   : > { %v683_v50 = vpop.f32.mrf.mxu0 }
 0x127   : > { %v790_v51 = vpop.f32.mrf.mxu1 }
 0x128   : > { %v685_v52 = vpop.f32.mrf.mxu0 }
 0x129   : > { %v792_v53 = vpop.f32.mrf.mxu1 }
 0x12a   : > { %v3015_v54 = vpop.f32.mrf.mxu0 }
 0x12b   : > { %v3017_v55 = vpop.f32.mrf.mxu1 }
 0x12c   : > { %v3019_v56 = vpop.f32.mrf.mxu0 }
 0x12d   : > { %v3021_v57 = vpop.f32.mrf.mxu1 }
 0x12e   : > { %v3023_v58 = vpop.f32.mrf.mxu0 }
 0x12f   : > { %v3025_v59 = vpop.f32.mrf.mxu1 }
 0x130   : > { %v3027_v60 = vpop.f32.mrf.mxu0 }
 0x131   : > { %v3029_v61 = vpop.f32.mrf.mxu1 }
 0x132   : > { %v3031_v62 = vpop.f32.mrf.mxu0 }
 0x133   : > { %v3033_v63 = vpop.f32.mrf.mxu1 }
 0x134   : > { %v3035_v1 = vpop.f32.mrf.mxu0 }
 0x135   : > { %v3037_v2 = vpop.f32.mrf.mxu1 }
 0x136   : > { %v3043_v5 = vpop.f32.mrf.mxu0 }
 0x137   : > { %v3045_v6 = vpop.f32.mrf.mxu1 }
 0x138   : > { %v3049_v8 = vpop.f32.mrf.mxu0 }
 0x139   : > { %v3051_v9 = vpop.f32.mrf.mxu1 }
 0x13a   : > { %3384 = vst [vmem:[#allocation7_spill] sm:$0xff] %v3051_v9 }
 0x15e   : > { %v1099_v11 = vpop.f32.mrf.mxu0 }
 0x15f   : > { %v1206_v12 = vpop.f32.mrf.mxu1  ;;  %v3055_v13 = vadd.f32 %v1099_v11, %v671_v42 }
 0x160   : > { %v3057_v14 = vadd.f32 %v1206_v12, %v778_v43  ;;  %v1101_v15 = vpop.f32.mrf.mxu0 }
 0x161   : > { %v1208_v16 = vpop.f32.mrf.mxu1  ;;  %v3059_v18 = vadd.f32 %v1101_v15, %v673_v44  ;;  %v1534_v26 = vmul.f32 %v1522_v17, %v3055_v13  ;;  %v1253_v15 = vpop.permute.xlu1 %1252 }
 0x162   : > { %v3061_v19 = vadd.f32 %v1208_v16, %v780_v45  ;;  %v1105_v20 = vpop.f32.mrf.mxu0  ;;  %v1536_v27 = vmul.f32 %v1522_v17, %v3057_v14 }
 0x163   : > { %v1212_v21 = vpop.f32.mrf.mxu1  ;;  %v3063_v0 = vadd.f32 %v1105_v20, %v677_v46  ;;  %v1535_v39 = vmul.f32 %v1522_v17, %v3059_v18  ;;  %v3092_v20 = vmul.f32 %v1253_v15, %v3055_v13 }
 0x164   : > { %v3065_v23 = vadd.f32 %v1212_v21, %v784_v47  ;;  %v1107_v24 = vpop.f32.mrf.mxu0  ;;  %v1537_v40 = vmul.f32 %v1522_v17, %v3061_v19 }
 0x165   : > { %v1214_v25 = vpop.f32.mrf.mxu1  ;;  %v1538_v28 = vmul.f32 %v1527_v22, %v3063_v0  ;;  %v3071_v30 = vadd.f32 %v1107_v24, %v679_v48 }
 0x166   : > { %v1540_v29 = vmul.f32 %v1527_v22, %v3065_v23  ;;  %v3073_v31 = vadd.f32 %v1214_v25, %v786_v49  ;;  %v1111_v32 = vpop.f32.mrf.mxu0  ;;  %v1258_v25 = vpop.permute.xlu0 %1257 }
 0x167   : > { %v1218_v33 = vpop.f32.mrf.mxu1  ;;  %v1546_v35 = vadd.f32 %v1538_v28, %v1534_v26  ;;  %v3075_v37 = vadd.f32 %v1111_v32, %v683_v50  ;;  %v1539_v42 = vmul.f32 %v1527_v22, %v3071_v30  ;;  %v3102_v26 = vmul.f32 %v1253_v15, %v3061_v19 }
 0x168   : > { %v1565_v36 = vadd.f32 %v1540_v29, %v1536_v27  ;;  %v3077_v38 = vadd.f32 %v1218_v33, %v790_v51  ;;  %v1541_v43 = vmul.f32 %v1527_v22, %v3073_v31  ;;  %v1113_v44 = vpop.f32.mrf.mxu0  ;;  %v3106_v28 = vmul.f32 %v1258_v25, %v3063_v0 }
 0x169   : > { %v1220_v45 = vpop.f32.mrf.mxu1  ;;  %v1542_v46 = vmul.f32 %v1532_v34, %v3075_v37  ;;  %v1556_v48 = vadd.f32 %v1539_v42, %v1535_v39  ;;  %v3085_v50 = vadd.f32 %v1113_v44, %v685_v52  ;;  %v3096_v52 = vmul.f32 %v1253_v15, %v3057_v14 }
 0x16a   : > { %v1544_v47 = vmul.f32 %v1532_v34, %v3077_v38  ;;  %v1574_v49 = vadd.f32 %v1541_v43, %v1537_v40  ;;  %v3087_v51 = vadd.f32 %v1220_v45, %v792_v53  ;;  %v1117_v11 = vpop.f32.mrf.mxu0  ;;  %v3099_v53 = vmul.f32 %v1253_v15, %v3059_v18 }
 0x16b   : > { %v1224_v12 = vpop.f32.mrf.mxu1  ;;  %v1548_v16 = vsel %vm1547_vm2, %v1542_v46, 0.0  ;;  %v1543_v24 = vmul.f32 %v1532_v34, %v3085_v50  ;;  %3385 = vst [vmem:[#allocation8_spill] sm:$0xff] %v3096_v52  ;;  %v1118_v42 = vadd.f32 %v1117_v11, %v3015_v54  ;;  %v3113_v44 = vmul.f32 %v1258_v25, %v3065_v23 }
 0x16c   : > { %v1566_v17 = vsel %vm1547_vm2, %v1544_v47, 0.0  ;;  %v1549_v21 = vadd.f32 %v1548_v16, %v1546_v35  ;;  %v1545_v27 = vmul.f32 %v1532_v34, %v3087_v51  ;;  %v1119_v35 = vpop.f32.mrf.mxu0  ;;  %v1225_v43 = vadd.f32 %v1224_v12, %v3017_v55  ;;  %v1263_v16 = vpop.permute.xlu1 %1262 }
 0x16d   : > { %v1567_v22 = vadd.f32 %v1566_v17, %v1565_v36  ;;  %v1557_v33 = vsel %vm1547_vm2, %v1543_v24, 0.0  ;;  %v1226_v36 = vpop.f32.mrf.mxu1  ;;  %v3116_v47 = vmul.f32 %v1258_v25, %v3071_v30  ;;  %v3119_v15 = vmul.f32 %v1258_v25, %v3073_v31 }
 0x16e   : > { %v1550_v29 = vrot.slane %v1549_v21, 4  ;;  %v1558_v39 = vadd.f32 %v1557_v33, %v1556_v48  ;;  %v1575_v40 = vsel %vm1547_vm2, %v1545_v27, 0.0  ;;  %v1120_v17 = vadd.f32 %v1119_v35, %v3019_v56  ;;  %v1123_v12 = vpop.f32.mrf.mxu0 }
 0x16f   : > { %v1568_v32 = vrot.slane %v1567_v22, 4  ;;  %v1576_v46 = vadd.f32 %v1575_v40, %v1574_v49  ;;  %v3123_v55 = vmul.f32 %v1263_v16, %v3075_v37  ;;  %v3126_v49 = vmul.f32 %v1263_v16, %v3077_v38 }
 0x170   : > { %v1551_v34 = vadd.f32 %v1550_v29, %v1549_v21  ;;  %v1559_v48 = vrot.slane %v1558_v39, 4  ;;  %v1230_v21 = vpop.f32.mrf.mxu1  ;;  %v3129_v27 = vadd.f32 %v3053_v10, %v1118_v42  ;;  %v3132_v25 = vadd.f32 %v3053_v10, %v1225_v43 }
 0x171   : > { %v1569_v45 = vadd.f32 %v1568_v32, %v1567_v22  ;;  %3386 = vst [vmem:[#allocation9_spill] sm:$0xff] %v3123_v55  ;;  %v1577_v11 = vrot.slane %v1576_v46, 4  ;;  %3387 = vst [vmem:[#allocation10_spill] sm:$0xff] %v3126_v49  ;;  %v1227_v33 = vadd.f32 %v1226_v36, %v3021_v57  ;;  %v3136_v40 = vadd.f32 %v3053_v10, %v1120_v17 }
 0x172   : > { %v1552_v24 = vrot.slane %v1551_v34, 2  ;;  %v1560_v22 = vadd.f32 %v1559_v48, %v1558_v39  ;;  %3388 = vst [vmem:[#allocation11_spill] sm:$0xff] %v3129_v27  ;;  %3389 = vst [vmem:[#allocation12_spill] sm:$0xff] %v3132_v25  ;;  %v1124_v41 = vadd.f32 %v1123_v12, %v3023_v58  ;;  %v1231_v3 = vadd.f32 %v1230_v21, %v3025_v59  ;;  %v1601_v39 = vpop.permute.xlu0 %1600  ;;  %v1125_v21 = vpop.f32.mrf.mxu0 }
 0x173   : > { %v1570_v54 = vrot.slane %v1569_v45, 2  ;;  %v1578_v32 = vadd.f32 %v1577_v11, %v1576_v46  ;;  %3390 = vst [vmem:[#allocation13_spill] sm:$0xff] %v3136_v40  ;;  %v3141_v9 = vmul.f32 %v1263_v16, %v3085_v50  ;;  %v3149_v59 = vadd.f32 %v3053_v10, %v1227_v33 }
 0x174   : > { %v1553_v29 = vadd.f32 %v1552_v24, %v1551_v34  ;;  %v1561_v35 = vrot.slane %v1560_v22, 2  ;;  %v1606_v24 = vpop.permute.xlu1 %1605  ;;  %v3153_v12 = vadd.f32 %v3041_v4, %v1124_v41  ;;  %v1232_v41 = vpop.f32.mrf.mxu1  ;;  %v1126_v57 = vadd.f32 %v1125_v21, %v3027_v60 }
 0x175   : > { %v1571_v56 = vadd.f32 %v1570_v54, %v1569_v45  ;;  %v1579_v43 = vrot.slane %v1578_v32, 2  ;;  %v3144_v45 = vmul.f32 %v1263_v16, %v3087_v51  ;;  %3391 = vst [vmem:[#allocation14_spill] sm:$0xff] %v3149_v59  ;;  %v3156_v16 = vadd.f32 %v3041_v4, %v1231_v3  ;;  %v1129_v25 = vpop.f32.mrf.mxu0 }
 0x176   : > { %v1554_v48 = vrot.slane %v1553_v29, 1  ;;  %v1562_v34 = vadd.f32 %v1561_v35, %v1560_v22 }
 0x177   : > { %v1572_v42 = vrot.slane %v1571_v56, 1  ;;  %v1580_v58 = vadd.f32 %v1579_v43, %v1578_v32 }
 0x178   : > { %v1555_v46 = vadd.f32 %v1554_v48, %v1553_v29  ;;  %v1563_v54 = vrot.slane %v1562_v34, 1 }
 0x179   : > { %v1573_v17 = vadd.f32 %v1572_v42, %v1571_v56  ;;  %v1581_v56 = vrot.slane %v1580_v58, 1  ;;  %v1611_v42 = vpop.permute.xlu0 %1610 }
 0x17a   : > { %v1591_v22 = vmul.f32 %v1555_v46, %v3123_v55  ;;  %v1587_v32 = vmul.f32 %v1555_v46, %v3106_v28  ;;  %v1564_v35 = vadd.f32 %v1563_v54, %v1562_v34  ;;  %v1583_v33 = vmul.f32 %v1555_v46, %v3092_v20 }
 0x17b   : > { %v1593_v29 = vmul.f32 %v1573_v17, %v3126_v49  ;;  %v1589_v10 = vmul.f32 %v1573_v17, %v3113_v44  ;;  %v1585_v48 = vmul.f32 %v1573_v17, %v3096_v52  ;;  %v1582_v43 = vadd.f32 %v1581_v56, %v1580_v58  ;;  %v1643_v58 = vpop.permute.xlu1 %1642 }
 0x17c   : > { %v1617_v3 = vadd.f32 %v1606_v24, %v1587_v32  ;;  %v1592_v11 = vmul.f32 %v1564_v35, %v3141_v9  ;;  %v1588_v49 = vmul.f32 %v1564_v35, %v3116_v47  ;;  %v1584_v34 = vmul.f32 %v1564_v35, %v3099_v53 }
 0x17d   : > { %v1619_v55 = vadd.f32 %v1606_v24, %v1589_v10  ;;  %v1594_v54 = vmul.f32 %v1582_v43, %v3144_v45  ;;  %v1590_v46 = vmul.f32 %v1582_v43, %v3119_v15  ;;  %v1586_v56 = vmul.f32 %v1582_v43, %v3102_v26  ;;  %v1236_v10 = vpop.f32.mrf.mxu1 }
 0x17e   : > { %v3172_v17 = vadd.f32 %v1617_v3, %v3063_v0  ;;  %v1622_v32 = vadd.f32 %v1611_v42, %v1592_v11  ;;  %v1618_v36 = vadd.f32 %v1606_v24, %v1588_v49  ;;  %v1613_v21 = vadd.f32 %v1601_v39, %v1583_v33  ;;  %v1648_v49 = vpop.permute.xlu0 %1647 }
 0x17f   : > { %v3176_v60 = vadd.f32 %v1619_v55, %v3065_v23  ;;  %v1624_v27 = vadd.f32 %v1611_v42, %v1594_v54  ;;  %v1620_v35 = vadd.f32 %v1606_v24, %v1590_v46  ;;  %v1614_v59 = vadd.f32 %v1601_v39, %v1584_v34 }
 0x180   : > { %v1615_v40 = vadd.f32 %v1601_v39, %v1585_v48  ;;  %v3179_v52 = vadd.f32 %v1622_v32, %v3085_v50  ;;  %v3182_v0 = vadd.f32 %v1618_v36, %v3071_v30  ;;  %v1616_v3 = vadd.f32 %v1601_v39, %v1586_v56  ;;  %v1653_v48 = vpop.permute.xlu1 %1652 }
 0x181   : > { %v3185_v11 = vadd.f32 %v1613_v21, %v3055_v13  ;;  %v3188_v23 = vadd.f32 %v1624_v27, %v3087_v51  ;;  %v3191_v55 = vadd.f32 %v1620_v35, %v3073_v31  ;;  %v3194_v24 = vadd.f32 %v1614_v59, %v3059_v18  ;;  %v1131_v51 = vpop.f32.mrf.mxu0  ;;  %v1238_v27 = vpop.f32.mrf.mxu1 }
 0x182   : > { %v3197_v50 = vadd.f32 %v1615_v40, %v3057_v14  ;;  %v3200_v30 = vadd.f32 %v1616_v3, %v3061_v19  ;;  %v1659_v13 = vmul.f32 %v1648_v49, %v3172_v17  ;;  %v1660_v36 = vmul.f32 %v1648_v49, %v3182_v0 }
 0x183   : > { %v1655_v39 = vmul.f32 %v1643_v58, %v3185_v11  ;;  %v1656_v31 = vmul.f32 %v1643_v58, %v3194_v24  ;;  %v1661_v18 = vmul.f32 %v1648_v49, %v3176_v60  ;;  %v1662_v14 = vmul.f32 %v1648_v49, %v3191_v55  ;;  %v1135_v49 = vpop.f32.mrf.mxu0  ;;  %v1242_v40 = vpop.f32.mrf.mxu1 }
 0x184   : > { %v1657_v33 = vmul.f32 %v1643_v58, %v3197_v50  ;;  %v1658_v19 = vmul.f32 %v1643_v58, %v3200_v30  ;;  %v1621_v43 = vadd.f32 %v1611_v42, %v1591_v22  ;;  %v1623_v46 = vadd.f32 %v1611_v42, %v1593_v29 }
 0x185   : > { %v1667_v59 = vadd.f32 %v1659_v13, %v1655_v39  ;;  %v1676_v34 = vadd.f32 %v1660_v36, %v1656_v31  ;;  %v1664_v56 = vmul.f32 %v1653_v48, %v3179_v52  ;;  %v3213_v21 = vadd.f32 %v3041_v4, %v1126_v57  ;;  %v3228_v36 = vpop.permute.xlu0 %1720 }
 0x186   : > { %v1685_v54 = vadd.f32 %v1661_v18, %v1657_v33  ;;  %v1694_v32 = vadd.f32 %v1662_v14, %v1658_v19  ;;  %v3216_v35 = vadd.f32 %v1621_v43, %v3075_v37  ;;  %v1666_v3 = vmul.f32 %v1653_v48, %v3188_v23  ;;  %v1137_v14 = vpop.f32.mrf.mxu0  ;;  %v1244_v19 = vpop.f32.mrf.mxu1 }
 0x187   : > { %v1233_v58 = vadd.f32 %v1232_v41, %v3029_v61  ;;  %v3221_v22 = vadd.f32 %v1623_v46, %v3077_v38  ;;  %v1677_v29 = vsel %vm1547_vm2, %v1664_v56, 0.0  ;;  %v1132_v42 = vadd.f32 %v1131_v51, %v3035_v1 }
 0x188   : > { %v1663_v39 = vmul.f32 %v1653_v48, %v3216_v35  ;;  %v1678_v57 = vadd.f32 %v1677_v29, %v1676_v34  ;;  %v1695_v13 = vsel %vm1547_vm2, %v1666_v3, 0.0  ;;  %v1239_v37 = vadd.f32 %v1238_v27, %v3037_v2  ;;  %v3248_v29 = vpop.permute.xlu1 %1725 }
 0x189   : > { %v1130_v31 = vadd.f32 %v1129_v25, %v3031_v62  ;;  %v1237_v61 = vadd.f32 %v1236_v10, %v3033_v63  ;;  %v1665_v38 = vmul.f32 %v1653_v48, %v3221_v22  ;;  %v1696_v41 = vadd.f32 %v1695_v13, %v1694_v32 }
 0x18a   : > { %v1668_v33 = vsel %vm1547_vm2, %v1663_v39, 0.0  ;;  %v1679_v18 = vrot.slane %v1678_v57, 4  ;;  %v1136_v1 = vadd.f32 %v1135_v49, %v3043_v5  ;;  %v1243_v51 = vadd.f32 %v1242_v40, %v3045_v6  ;;  %v3392_v6 = vld [vmem:[#allocation7_spill] sm:$0xff]  ;;  %v3246_v49 = vpop.permute.xlu0 %1730 }
 0x18b   : > { %v3237_v2 = vadd.f32 %v3041_v4, %v1233_v58  ;;  %v1669_v27 = vadd.f32 %v1668_v33, %v1667_v59  ;;  %v1686_v62 = vsel %vm1547_vm2, %v1665_v38, 0.0  ;;  %v1697_v25 = vrot.slane %v1696_v41, 4  ;;  %v3393_v4 = vld [vmem:[#allocation6_spill] sm:$0xff] }
 0x18c   : > { %v1680_v63 = vadd.f32 %v1679_v18, %v1678_v57  ;;  %v1687_v10 = vadd.f32 %v1686_v62, %v1685_v54  ;;  %v1310_v48 = vadd.f32 %v3047_v7, %v1132_v42  ;;  %v1312_v43 = vadd.f32 %v3047_v7, %v1239_v37 }
 0x18d   : > { %v1670_v34 = vrot.slane %v1669_v27, 4  ;;  %v1698_v46 = vadd.f32 %v1697_v25, %v1696_v41  ;;  %v1138_v5 = vadd.f32 %v1137_v14, %v3049_v8  ;;  %v1245_v40 = vadd.f32 %v1244_v19, %v3392_v6 }
 0x18e   : > { %v1681_v56 = vrot.slane %v1680_v63, 2  ;;  %v1688_v32 = vrot.slane %v1687_v10, 4  ;;  %v1313_v3 = vadd.f32 %v3393_v4, %v1136_v1  ;;  %v1315_v59 = vadd.f32 %v3393_v4, %v1243_v51 }
 0x18f   : > { %v1671_v58 = vadd.f32 %v1670_v34, %v1669_v27  ;;  %v1699_v54 = vrot.slane %v1698_v46, 2  ;;  %v1314_v42 = vadd.f32 %v3393_v4, %v1138_v5  ;;  %v1316_v39 = vadd.f32 %v3393_v4, %v1245_v40 }
 0x190   : > { %v1309_v8 = vadd.f32 %v3047_v7, %v1130_v31  ;;  %v1311_v57 = vadd.f32 %v3047_v7, %v1237_v61  ;;  %v1682_v13 = vadd.f32 %v1681_v56, %v1680_v63  ;;  %v1689_v37 = vadd.f32 %v1688_v32, %v1687_v10 }
 0x191   : > { %v1672_v38 = vrot.slane %v1671_v58, 2  ;;  %v1700_v41 = vadd.f32 %v1699_v54, %v1698_v46  ;;  %v1330_v33 = vmax.f32 %v1314_v42, 0.0  ;;  %v1332_v18 = vmax.f32 %v1316_v39, 0.0  ;;  %v3256_v46 = vpop.permute.xlu0 %1344 }
 0x192   : > { %v1690_v1 = vrot.slane %v1689_v37, 2  ;;  %v1329_v51 = vmax.f32 %v1313_v3, 0.0  ;;  %v1331_v14 = vmax.f32 %v1315_v59, 0.0  ;;  %v1683_v19 = vrot.slane %v1682_v13, 1 }
 0x193   : > { %v1673_v27 = vadd.f32 %v1672_v38, %v1671_v58  ;;  %v1326_v62 = vmax.f32 %v1310_v48, 0.0  ;;  %v1328_v25 = vmax.f32 %v1312_v43, 0.0  ;;  %v1701_v34 = vrot.slane %v1700_v41, 1  ;;  %1378 = vmatprep.subr.mxu0 %v1330_v33  ;;  %1455 = vmatprep.subr.mxu1 %v1332_v18  ;;  %v3258_v48 = vpop.permute.xlu1 %1339 }
 0x194   : > { %v1325_v31 = vmax.f32 %v1309_v8, 0.0  ;;  %v1327_v5 = vmax.f32 %v1311_v57, 0.0  ;;  %v1691_v7 = vadd.f32 %v1690_v1, %v1689_v37  ;;  %v1684_v61 = vadd.f32 %v1683_v19, %v1682_v13  ;;  %1379 = vmatpush1.msra.mxu0 %v1329_v51  ;;  %1456 = vmatpush1.msra.mxu1 %v1331_v14  ;;  %v3395_v57 = vld [vmem:[#allocation8_spill] sm:$0xff]  ;;  %v3396_v37 = vld [vmem:[#allocation13_spill] sm:$0xff] }
 0x195   : > { %v1322_v63 = vmax.f32 %v3213_v21, 0.0  ;;  %v1324_v10 = vmax.f32 %v3237_v2, 0.0  ;;  %v1674_v6 = vrot.slane %v1673_v27, 1  ;;  %v1702_v40 = vadd.f32 %v1701_v34, %v1700_v41  ;;  %1380 = vmatprep.subr.mxu0 %v1326_v62  ;;  %1457 = vmatprep.subr.mxu1 %v1328_v25  ;;  %v1816_v38 = vpop.permute.xlu0 %1815 }
 0x196   : > { %v1692_v43 = vrot.slane %v1691_v7, 1  ;;  %v1708_v56 = vmul.f32 %v1684_v61, %v3116_v47  ;;  %v1704_v32 = vmul.f32 %v1684_v61, %v3099_v53  ;;  %1381 = vmatpush1.msra.mxu0 %v1325_v31  ;;  %1458 = vmatpush1.msra.mxu1 %v1327_v5  ;;  %v1712_v4 = vmul.f32 %v1684_v61, %v3141_v9  ;;  %v3402_v31 = vld [vmem:[#allocation12_spill] sm:$0xff] }
 0x197   : > { %v1323_v21 = vmax.f32 %v3156_v16, 0.0  ;;  %v1675_v2 = vadd.f32 %v1674_v6, %v1673_v27  ;;  %v1710_v3 = vmul.f32 %v1702_v40, %v3119_v15  ;;  %v1706_v59 = vmul.f32 %v1702_v40, %v3102_v26  ;;  %1382 = vmatprep.subr.mxu0 %v1322_v63  ;;  %1459 = vmatprep.subr.mxu1 %v1324_v10  ;;  %v3400_v27 = vld [vmem:[#allocation11_spill] sm:$0xff] }
 0x198   : > { %v1693_v58 = vadd.f32 %v1692_v43, %v1691_v7  ;;  %v1738_v54 = vadd.f32 %v3248_v29, %v1708_v56  ;;  %v1734_v47 = vadd.f32 %v3228_v36, %v1704_v32  ;;  %v1714_v53 = vmul.f32 %v1702_v40, %v3144_v45 }
 0x199   : > { %v3394_v42 = vmax.f32 %v3153_v12, 0.0  ;;  %v1707_v9 = vmul.f32 %v1675_v2, %v3106_v28  ;;  %v1740_v16 = vadd.f32 %v3248_v29, %v1710_v3  ;;  %v1703_v15 = vmul.f32 %v1675_v2, %v3092_v20  ;;  %1460 = vmatpush1.msra.mxu1 %v1323_v21  ;;  %v1811_v20 = vpop.permute.xlu1 %1810 }
 0x19a   : > { %v1736_v26 = vadd.f32 %v3228_v36, %v1706_v59  ;;  %v1709_v39 = vmul.f32 %v1693_v58, %v3113_v44  ;;  %v1750_v8 = vadd.f32 %v1738_v54, %v3182_v0  ;;  %v1705_v13 = vmul.f32 %v1693_v58, %v3395_v57  ;;  %v3398_v44 = vld [vmem:[#allocation14_spill] sm:$0xff]  ;;  %v1333_v0 = vld [vmem:[%s3367_s2 + $0x80] sm:$0xff] }
 0x19b   : > { %1383 = vmatpush1.msra.mxu0 %v3394_v42  ;;  %v1746_v45 = vadd.f32 %v1734_v47, %v3194_v24  ;;  %v3397_v12 = vmax.f32 %v3396_v37, 0.0  ;;  %v1737_v28 = vadd.f32 %v3248_v29, %v1707_v9  ;;  %v1752_v41 = vadd.f32 %v1740_v16, %v3191_v55 }
 0x19c   : > { %v1733_v33 = vadd.f32 %v3228_v36, %v1703_v15  ;;  %v1748_v18 = vadd.f32 %v1736_v26, %v3200_v30  ;;  %v3399_v1 = vmax.f32 %v3398_v44, 0.0  ;;  %v1739_v24 = vadd.f32 %v3248_v29, %v1709_v39 }
 0x19d   : > { %1384 = vmatprep.subr.mxu0 %v3397_v12  ;;  %v1735_v51 = vadd.f32 %v3228_v36, %v1705_v13  ;;  %v1824_v14 = vmul.f32 %v1811_v20, %v1746_v45  ;;  %v1828_v19 = vmul.f32 %v1816_v38, %v1750_v8  ;;  %v3401_v55 = vmax.f32 %v3400_v27, 0.0  ;;  %v3404_v36 = vld [vmem:[#allocation9_spill] sm:$0xff]  ;;  %v1821_v42 = vpop.permute.xlu1 %1820 }
 0x19e   : > { %1461 = vmatprep.subr.mxu1 %v3399_v1  ;;  %v1749_v62 = vadd.f32 %v1737_v28, %v3172_v17  ;;  %v1745_v30 = vadd.f32 %v1733_v33, %v3185_v11  ;;  %v1826_v25 = vmul.f32 %v1811_v20, %v1748_v18  ;;  %v1830_v34 = vmul.f32 %v1816_v38, %v1752_v41  ;;  %v3405_v17 = vld [vmem:[#allocation10_spill] sm:$0xff] }
 0x19f   : > { %1385 = vmatpush1.msra.mxu0 %v3401_v55  ;;  %v3403_v5 = vmax.f32 %v3402_v31, 0.0  ;;  %v1751_v7 = vadd.f32 %v1739_v24, %v3176_v60  ;;  %v1747_v29 = vadd.f32 %v1735_v51, %v3197_v50  ;;  %v1844_v61 = vadd.f32 %v1828_v19, %v1824_v14  ;;  %v1334_v11 = vld [vmem:[%s3367_s2 + $0x88] sm:$0xff] }
 0x1a0   : > { %v1711_v63 = vmul.f32 %v1675_v2, %v3404_v36  ;;  %2166 = vmatmul.mubr.msk.f32.vlgmr.msra.gmra.mxu0 %vm1347_vm3, %v1333_v0  ;;  %v1823_v10 = vmul.f32 %v1811_v20, %v1745_v30  ;;  %v1827_v6 = vmul.f32 %v1816_v38, %v1749_v62  ;;  %v1862_v40 = vadd.f32 %v1830_v34, %v1826_v25 }
 0x1a1   : > { %1462 = vmatpush1.msra.mxu1 %v3403_v5  ;;  %v1713_v43 = vmul.f32 %v1693_v58, %v3405_v17  ;;  %v1825_v56 = vmul.f32 %v1811_v20, %v1747_v29  ;;  %v1829_v60 = vmul.f32 %v1816_v38, %v1751_v7  ;;  %v1742_v32 = vadd.f32 %v3246_v49, %v1712_v4  ;;  %v1762_v7 = vpop.permute.xlu0 %1761 }
 0x1a2   : > { %2168 = vmatmul.mubr.msk.f32.vlgmr.msra.gmra.mxu1 %vm1347_vm3, %v1333_v0  ;;  %v1741_v50 = vadd.f32 %v3246_v49, %v1711_v63  ;;  %v3406_v21 = vmov 0.0   ;;  %v1835_v2 = vadd.f32 %v1827_v6, %v1823_v10  ;;  %v1744_v59 = vadd.f32 %v3246_v49, %v1714_v53 }
 0x1a3   : > { %1424 = vmatprep.mubr.f32.mxu0 %v3406_v21  ;;  %v1743_v3 = vadd.f32 %v3246_v49, %v1713_v43  ;;  %1501 = vmatprep.mubr.f32.mxu1 %v3406_v21  ;;  %v1853_v58 = vadd.f32 %v1829_v60, %v1825_v56  ;;  %v1754_v47 = vadd.f32 %v1742_v32, %v3179_v52 }
 0x1a4   : > { %v1753_v54 = vadd.f32 %v1741_v50, %v3216_v35  ;;  %2167 = vmatmul.mubr.msk.f32.gmra.mxu0 %vm1347_vm3, %v1334_v11  ;;  %v1756_v4 = vadd.f32 %v1744_v59, %v3188_v23 }
 0x1a5   : > { %v1755_v9 = vadd.f32 %v1743_v3, %v3221_v22  ;;  %v1832_v15 = vmul.f32 %v1821_v42, %v1754_v47 }
 0x1a6   : > { %2169 = vmatmul.mubr.msk.f32.gmra.mxu1 %vm1347_vm3, %v1334_v11  ;;  %v1831_v16 = vmul.f32 %v1821_v42, %v1753_v54  ;;  %v1834_v49 = vmul.f32 %v1821_v42, %v1756_v4 }
 0x1a7   : > { %v1833_v26 = vmul.f32 %v1821_v42, %v1755_v9  ;;  %v1845_v39 = vsel %vm1547_vm2, %v1832_v15, 0.0 }
 0x1a8   : > { %v1836_v53 = vsel %vm1547_vm2, %v1831_v16, 0.0  ;;  %v1846_v8 = vadd.f32 %v1845_v39, %v1844_v61  ;;  %v1863_v57 = vsel %vm1547_vm2, %v1834_v49, 0.0 }
 0x1a9   : > { %v1837_v35 = vadd.f32 %v1836_v53, %v1835_v2  ;;  %v1854_v52 = vsel %vm1547_vm2, %v1833_v26, 0.0  ;;  %v1864_v22 = vadd.f32 %v1863_v57, %v1862_v40 }
 0x1aa   : > { %v1855_v13 = vadd.f32 %v1854_v52, %v1853_v58  ;;  %v1847_v41 = vrot.slane %v1846_v8, 4 }
 0x1ab   : > { %v1838_v12 = vrot.slane %v1837_v35, 4  ;;  %v1865_v0 = vrot.slane %v1864_v22, 4 }
 0x1ac   : > { %v1856_v18 = vrot.slane %v1855_v13, 4  ;;  %v1848_v30 = vadd.f32 %v1847_v41, %v1846_v8 }
 0x1ad   : > { %v1839_v19 = vadd.f32 %v1838_v12, %v1837_v35  ;;  %v1866_v10 = vadd.f32 %v1865_v0, %v1864_v22 }
 0x1ae   : > { %v1857_v29 = vadd.f32 %v1856_v18, %v1855_v13  ;;  %v1849_v50 = vrot.slane %v1848_v30, 2  ;;  %v2468_v18 = vmov 1966171168  }
 0x1af   : > { %v1840_v43 = vrot.slane %v1839_v19, 2  ;;  %v1867_v9 = vrot.slane %v1866_v10, 2 }
 0x1b0   : > { %v1858_v3 = vrot.slane %v1857_v29, 2  ;;  %v1850_v49 = vadd.f32 %v1849_v50, %v1848_v30 }
 0x1b1   : > { %v1841_v16 = vadd.f32 %v1840_v43, %v1839_v19  ;;  %v1868_v57 = vadd.f32 %v1867_v9, %v1866_v10 }
 0x1b2   : > { %v1859_v53 = vadd.f32 %v1858_v3, %v1857_v29  ;;  %v1851_v12 = vrot.slane %v1850_v49, 1 }
 0x1b3   : > { %v1869_v0 = vrot.slane %v1868_v57, 1 }
 0x1b5   : > { %v1870_v29 = vadd.f32 %v1869_v0, %v1868_v57 }
 0x260   : > { %v1420_v45 = vpop.f32.mrf.mxu0 }
 0x261   : > { %v1421_v23 = vadd.f32 %v1420_v45, %v3258_v48  ;;  %v1842_v45 = vrot.slane %v1841_v16, 1 }
 0x262   : > { %v1497_v37 = vpop.f32.mrf.mxu1  ;;  %v1422_v28 = vpop.f32.mrf.mxu0 }
 0x263   : > { %v1498_v38 = vadd.f32 %v1497_v37, %v3258_v48  ;;  %v1423_v20 = vadd.f32 %v1422_v28, %v3258_v48  ;;  %v1508_v24 = vmax.f32 %v1421_v23, 0.0 }
 0x264   : > { %v1499_v33 = vpop.f32.mrf.mxu1  ;;  %v1426_v1 = vpop.f32.mrf.mxu0 }
 0x265   : > { %v1500_v44 = vadd.f32 %v1499_v33, %v3258_v48  ;;  %v1427_v51 = vadd.f32 %v1426_v1, %v3256_v46  ;;  %v1510_v27 = vmax.f32 %v1498_v38, 0.0  ;;  %v1509_v25 = vmax.f32 %v1423_v20, 0.0  ;;  %v1767_v48 = vpop.permute.xlu1 %1766 }
 0x266   : > { %v1503_v14 = vpop.f32.mrf.mxu1  ;;  %v1428_v62 = vpop.f32.mrf.mxu0  ;;  %v1769_v6 = vmul.f32 %v1762_v7, %v1508_v24  ;;  %v1860_v38 = vrot.slane %v1859_v53, 1  ;;  %v1890_v1 = vlaneseq }
 0x267   : > { %v1504_v55 = vadd.f32 %v1503_v14, %v3256_v46  ;;  %v1512_v34 = vmax.f32 %v1427_v51, 0.0  ;;  %v1429_v31 = vadd.f32 %v1428_v62, %v3256_v46  ;;  %v1511_v61 = vmax.f32 %v1500_v44, 0.0 }
 0x268   : > { %v1505_v5 = vpop.f32.mrf.mxu1  ;;  %v1771_v11 = vmul.f32 %v1762_v7, %v1510_v27  ;;  %v1770_v32 = vmul.f32 %v1762_v7, %v1509_v25  ;;  %v1888_v44 = vunpack.c.l.s4 %v2468_v18  ;;  %v1843_v14 = vadd.f32 %v1842_v45, %v1841_v16 }
 0x269   : > { %v1514_v36 = vmax.f32 %v1504_v55, 0.0  ;;  %v1506_v63 = vadd.f32 %v1505_v5, %v3256_v46  ;;  %v1773_v40 = vmul.f32 %v1767_v48, %v1512_v34  ;;  %v1513_v17 = vmax.f32 %v1429_v31, 0.0 }
 0x26a   : > { %v1772_v59 = vmul.f32 %v1762_v7, %v1511_v61  ;;  %v1852_v55 = vadd.f32 %v1851_v12, %v1850_v49  ;;  %v1861_v62 = vadd.f32 %v1860_v38, %v1859_v53  ;;  %v1889_v5 = vunpack.c.0.s8 %v1888_v44 }
 0x26b   : > { %v1775_v56 = vmul.f32 %v1767_v48, %v1514_v36  ;;  %v1515_v60 = vmax.f32 %v1506_v63, 0.0  ;;  %v1777_v21 = vadd.f32 %v1773_v40, %v1769_v6  ;;  %v1774_v2 = vmul.f32 %v1767_v48, %v1513_v17 }
 0x26c   : > { %v1891_v7 = vshrl.u32 %v1890_v1, 7  ;;  %vm1912_vm4 = vcmp.lt.s32.totalorder %v1890_v1, 512 }
 0x26d   : > { %v1791_v58 = vadd.f32 %v1775_v56, %v1771_v11  ;;  %v1776_v54 = vmul.f32 %v1767_v48, %v1515_v60  ;;  %v1778_v47 = vrot.slane %v1777_v21, 4  ;;  %v1784_v42 = vadd.f32 %v1774_v2, %v1770_v32 }
 0x26e   : > { %v1876_v48 = vstv %s1875_s4  ;;  %v1892_v17 = vsub.s32 %v1889_v5, %v1891_v7 }
 0x26f   : > { %v1792_v46 = vrot.slane %v1791_v58, 4  ;;  %v1798_v4 = vadd.f32 %v1776_v54, %v1772_v59  ;;  %v1779_v15 = vadd.f32 %v1778_v47, %v1777_v21  ;;  %v1785_v26 = vrot.slane %v1784_v42, 4 }
 0x271   : > { %v1793_v39 = vadd.f32 %v1792_v46, %v1791_v58  ;;  %v1799_v35 = vrot.slane %v1798_v4, 4  ;;  %v1780_v8 = vrot.slane %v1779_v15, 2  ;;  %v1786_v52 = vadd.f32 %v1785_v26, %v1784_v42 }
 0x273   : > { %v1794_v13 = vrot.slane %v1793_v39, 2  ;;  %v1800_v22 = vadd.f32 %v1799_v35, %v1798_v4  ;;  %v1781_v23 = vadd.f32 %v1780_v8, %v1779_v15  ;;  %v1787_v37 = vrot.slane %v1786_v52, 2 }
 0x275   : > { %v1795_v28 = vadd.f32 %v1794_v13, %v1793_v39  ;;  %v1801_v41 = vrot.slane %v1800_v22, 2  ;;  %v1782_v20 = vrot.slane %v1781_v23, 1  ;;  %v1788_v33 = vadd.f32 %v1787_v37, %v1786_v52 }
 0x277   : > { %v1796_v24 = vrot.slane %v1795_v28, 1  ;;  %v1802_v51 = vadd.f32 %v1801_v41, %v1800_v22  ;;  %v1783_v19 = vadd.f32 %v1782_v20, %v1781_v23  ;;  %v1789_v27 = vrot.slane %v1788_v33, 1 }
 0x279   : > { %v1797_v30 = vadd.f32 %v1796_v24, %v1795_v28  ;;  %v1803_v25 = vrot.slane %v1802_v51, 1  ;;  %v1871_v34 = vadd.f32 %v1843_v14, %v1783_v19  ;;  %v1790_v31 = vadd.f32 %v1789_v27, %v1788_v33 }
 0x27b   : > { %v1873_v61 = vadd.f32 %v1861_v62, %v1797_v30  ;;  %v1804_v36 = vadd.f32 %v1803_v25, %v1802_v51  ;;  %v1872_v63 = vadd.f32 %v1852_v55, %v1790_v31  ;;  %v1877_v6 = vadd.f32 %v1876_v48, %v1871_v34 }
 0x27d   : > { %v1874_v10 = vadd.f32 %v1870_v29, %v1804_v36  ;;  %v1878_v40 = vadd.f32 %v1876_v48, %v1872_v63  ;;  %v1879_v43 = vadd.f32 %v1876_v48, %v1873_v61 }
 0x27f   : > { %v1880_v11 = vadd.f32 %v1876_v48, %v1874_v10  ;;  %v1885_v56 = vcombine.low %v1877_v6, %v1878_v40 }
 0x281   : > { %v1886_v60 = vcombine.low %v1879_v43, %v1880_v11  ;;  %v1893_v50 = vrot.slane %v1885_v56, %v1892_v17 }
 0x283   : > { %v1900_v32 = vrot.slane %v1886_v60, %v1892_v17 }
 0x285   : > { %v1901_v21 = vcombine.low %v1893_v50, %v1900_v32 }
 0x287   : > { %v1908_v2 = vrot.slane %v1901_v21, %v1892_v17 }
 0x289   : > { %1914 = vst.msk [vmem:[%s235_s13] sm:$0xf] %vm1912_vm4, %v1908_v2 }
 0x28a   : > { %2417 = shalt.err (!%p2414_p3)
}
 0x28b   : > { %s2418_s15 = scalar_lea.hbm %s1928_s27, 64  ;;  %s2422_s18 = scalar_lea.hbm %s3370_s5, 128 }
 0x28c   : > { %p2419_p4 = scmp.ne.s32.totalorder %s1928_s27, %s2418_s15  ;;  %p2423_p9 = scmp.lt.s32.totalorder %s1928_s27, %s3370_s5 }
 0x28d   : > { %p2424_p10 = scmp.lt.s32.totalorder %s2422_s18, %s2418_s15 }
 0x28e   : > { %p2420_p7 = pnand %p2419_p4, %p2538_p5 }
 0x28f   : > { %p2425_p11 = por %p2424_p10, %p2423_p9 }
 0x290   : > { %p2421_p8 = pneg %p2420_p7 }
 0x292   : > { %p2426_p12 = pnand %p2425_p11, %p2421_p8 }
 0x294   : > { %2429 = shalt.err (!%p2426_p12)
}
 0x295   : > { %2360 = dma.vmem_to_hbm [thread:$0]  (%p2538_p5), %s1931_s16, 64, %s1928_s27, %s1916_s7  }
 0x296 PF: > { %p2366_p13 = scmp.ge.s32.totalorder %s2464_s23, 2  ;;  %s1942_s9 = sand.u32 1, %s2452_s20  }
 0x297   : > { %s1943_s10 = scalar_lea.sflag [#allocation4], %s1942_s9 }
 0x298   : > { %p2363_p0 = pnand %p2366_p13, %p2542_p6 }
 0x29a   : > { %p2364_p1 = pneg %p2363_p0 }
 0x29c   : > { %2447 = dma.done.wait (%p2364_p1), %s1943_s10, 64  }
 0x29d   : > { %2449 = vsyncadd (%p2364_p1), %s1943_s10, 4294967232  ;;  %p16_p2 = scmp.ge.s32.totalorder %s2526_s25, 4   ;;  %s3407_s20 = smov %s2456_s21 }
 0x29e   : > { %s3408_s21 = smov %s2460_s22  ;;  %s3409_s22 = smov %s2536_s28 }
 0x29f   : > { %s3410_s23 = smov %s2526_s25  ;;  %18 = sbr.rel (!%p16_p2) target bundleno = 5 (0x5), region = 78 }
 0x2a4   :  { %1948 = vsyncpa [#allocation4], 1 }
 0x2a5   :  { %1950 = vsyncpa [#allocation4 + $0x1], 1 }

</bundles_post_ra>
